<compile_context>
chip_gen: v5e
topology: v5e:2x2
jax: 0.10.0
libtpu: 0.0.40
codegen_flags: <defaults>
</compile_context>

<pallas_src>
import jax
import jax.numpy as jnp
import numpy as np
from jax import lax
from jax.experimental import pallas as pl
from jax.experimental.pallas import tpu as pltpu


def _bilstm_kernel(x_ref, len_ref, wih_ref, whh_ref, b_ref,
                   y_ref, lh_ref, lc_ref, gx_ref):
    """Fused bidirectional LSTM over a padded, time-major batch.

    x_ref:   [T, B, E]  bf16 embedded tokens (time-major)
    len_ref: [B, 1]     int32 sequence lengths
    wih_ref: [E, 8H]    bf16, cols = [W_ih_fwd (4H) | W_ih_bwd (4H)], i,f,g,o
    whh_ref: [H, 8H]    bf16, cols = [W_hh_fwd (4H) | W_hh_bwd (4H)]
    b_ref:   [1, 8H]    f32 fused biases [b_fwd | b_bwd]
    y_ref:   [T, B, 2H] f32 output; [..., :H] fwd, [..., H:] bwd; 0 at pads
    lh_ref:  [B, 2H]    f32 final hidden [h_fwd | h_bwd]
    lc_ref:  [B, 2H]    f32 final cell   [c_fwd | c_bwd]
    gx_ref:  [T, B, 8H] f32 VMEM scratch: precomputed x @ W_ih + b
    """
    T, B, _ = x_ref.shape
    H = whh_ref.shape[0]
    G = 4 * H

    # ---- hoisted input projection for both directions (one big MXU op) ----
    x_flat = x_ref[...].reshape(T * B, x_ref.shape[2])
    gx = jnp.dot(x_flat, wih_ref[...], preferred_element_type=jnp.float32)
    gx_ref[...] = (gx + b_ref[...]).reshape(T, B, 2 * G)

    # Hoisted loop-invariants.
    whh = whh_ref[...]                                   # bf16 [H, 8H]
    len_col = len_ref[...]                               # [B, 1] int32
    len2 = jnp.concatenate([len_col, len_col], axis=0)   # [2B, 1]
    row_is_fwd = lax.broadcasted_iota(jnp.int32, (2 * B, 1), 0) < B

    def step(t, carry):
        hcat, ccat = carry                               # [2B, H] f32 each
        tb = T - 1 - t                                   # backward time index

        # One recurrent matmul for both directions: [2B, H] @ [H, 8H].
        ghh = jnp.dot(hcat.astype(whh.dtype), whh,
                      preferred_element_type=jnp.float32)        # [2B, 8H]
        g_f = gx_ref[t, :, 0:G] + ghh[:B, 0:G]                   # [B, 4H]
        g_b = gx_ref[tb, :, G:2 * G] + ghh[B:, G:2 * G]          # [B, 4H]
        g = jnp.concatenate([g_f, g_b], axis=0)                  # [2B, 4H]

        # Shared gate math (PyTorch i, f, g, o order), f32 on the VPU/EUP.
        i = jax.nn.sigmoid(g[:, 0 * H:1 * H])
        f = jax.nn.sigmoid(g[:, 1 * H:2 * H])
        gg = jnp.tanh(g[:, 2 * H:3 * H])
        o = jax.nn.sigmoid(g[:, 3 * H:4 * H])
        c_new = f * ccat + i * gg
        h_new = o * jnp.tanh(c_new)

        # Per-step validity mask built from lengths (no mask input array).
        tcur = jnp.where(row_is_fwd, t, tb)                      # [2B, 1]
        m = (tcur < len2).astype(jnp.float32)                    # [2B, 1]
        h_out = m * h_new                                        # 0 at pads

        # Store this step's outputs into the combined [T, B, 2H] buffer.
        y_ref[t, :, 0:H] = h_out[:B]
        y_ref[tb, :, H:2 * H] = h_out[B:]

        # Freeze state past each sequence's end (single blend per state).
        hcat = hcat + m * (h_new - hcat)
        ccat = ccat + m * (c_new - ccat)
        return hcat, ccat

    zeros = jnp.zeros((2 * B, H), jnp.float32)
    hcat, ccat = lax.fori_loop(0, T, step, (zeros, zeros), unroll=True)

    lh_ref[...] = jnp.concatenate([hcat[:B], hcat[B:]], axis=1)  # [B, 2H]
    lc_ref[...] = jnp.concatenate([ccat[:B], ccat[B:]], axis=1)  # [B, 2H]


def sequential_code_encoder(token_ids, lengths, params):
    """Equivalent of SequentialCodeEncoder.forward on a padded id batch.

    token_ids: [B, T] int32 (padded with 0); lengths: [B] int32 (>= 1).
    Returns (token_encodings [B, T, 2H], (last_state [B, 2H], last_cell [B, 2H])).
    """
    emb = params["embedding"]                                   # [V, E]
    B, T = token_ids.shape
    H = params["whh_f"].shape[0]

    # Embedding gather + layout plumbing stays as XLA glue.
    x = jnp.take(emb, token_ids, axis=0)                        # [B, T, E] f32
    x = jnp.transpose(x, (1, 0, 2)).astype(jnp.bfloat16)        # [T, B, E]
    len_col = lengths.astype(jnp.int32)[:, None]                # [B, 1]

    # Fold both directions' weights into single matmul operands (bf16 for the
    # MXU; f32 accumulation inside the kernel).
    wih = jnp.concatenate([params["wih_f"], params["wih_b"]], axis=1).astype(jnp.bfloat16)
    whh = jnp.concatenate([params["whh_f"], params["whh_b"]], axis=1).astype(jnp.bfloat16)
    b = jnp.concatenate([params["b_f"], params["b_b"]], axis=1).astype(jnp.float32)

    vmem = pl.BlockSpec(memory_space=pltpu.MemorySpace.VMEM)
    # TODO(synk): at production T/B/E, tile the batch with a grid +
    # dimension_semantics=("parallel",) so both v7x TensorCores are used and
    # VMEM (64 MiB on v7x) is not overrun; gridless is optimal at these sizes.
    y, last_state, last_cell = pl.pallas_call(
        _bilstm_kernel,
        out_shape=(
            jax.ShapeDtypeStruct((T, B, 2 * H), jnp.float32),   # y [T, B, 2H]
            jax.ShapeDtypeStruct((B, 2 * H), jnp.float32),      # last_state
            jax.ShapeDtypeStruct((B, 2 * H), jnp.float32),      # last_cell
        ),
        in_specs=[vmem] * 5,
        out_specs=(vmem, vmem, vmem),
        scratch_shapes=[pltpu.VMEM((T, B, 8 * H), jnp.float32)],
    )(x, len_col, wih, whh, b)

    token_encodings = jnp.transpose(y, (1, 0, 2))               # [B, T, 2H]
    return token_encodings, (last_state, last_cell)


def _reference(token_ids, lengths, params):
    """Pure-JAX f32 reference (same masked-packed-LSTM semantics)."""
    emb = params["embedding"]
    B, T = token_ids.shape
    H = params["whh_f"].shape[0]
    x = jnp.take(emb, token_ids, axis=0).astype(jnp.float32)    # [B, T, E]
    mask = (jnp.arange(T)[None, :] < lengths[:, None]).astype(jnp.float32)

    def run(direction):
        wih = params[f"wih_{direction}"]
        whh = params[f"whh_{direction}"]
        b = params[f"b_{direction}"]
        ts = range(T) if direction == "f" else range(T - 1, -1, -1)
        h = jnp.zeros((B, H), jnp.float32)
        c = jnp.zeros((B, H), jnp.float32)
        ys = [None] * T
        for t in ts:
            g = x[:, t, :] @ wih + h @ whh + b
            i = jax.nn.sigmoid(g[:, :H])
            f = jax.nn.sigmoid(g[:, H:2 * H])
            gg = jnp.tanh(g[:, 2 * H:3 * H])
            o = jax.nn.sigmoid(g[:, 3 * H:])
            c_new = f * c + i * gg
            h_new = o * jnp.tanh(c_new)
            m = mask[:, t][:, None]
            ys[t] = m * h_new
            h = m * h_new + (1.0 - m) * h
            c = m * c_new + (1.0 - m) * c
        return jnp.stack(ys, axis=1), h, c

    yf, hf, cf = run("f")
    yb, hb, cb = run("b")
    enc = jnp.concatenate([yf, yb], axis=-1)
    return enc, (jnp.concatenate([hf, hb], 1), jnp.concatenate([cf, cb], 1))


def make_params(key, vocab_size, token_embed_size, token_encoding_size):
    E = token_embed_size
    H = token_encoding_size // 2
    ks = jax.random.split(key, 9)
    scale = 0.1
    return {
        "embedding": scale * jax.random.normal(ks[0], (vocab_size, E), jnp.float32),
        # PyTorch stores weight_ih as [4H, E]; we keep the transposed layout
        # [E, 4H] for the matmul, and fold b_ih + b_hh into one bias [1, 4H].
        "wih_f": scale * jax.random.normal(ks[1], (E, 4 * H), jnp.float32),
        "whh_f": scale * jax.random.normal(ks[2], (H, 4 * H), jnp.float32),
        "b_f": (scale * jax.random.normal(ks[3], (1, 4 * H), jnp.float32)
                + scale * jax.random.normal(ks[4], (1, 4 * H), jnp.float32)),
        "wih_b": scale * jax.random.normal(ks[5], (E, 4 * H), jnp.float32),
        "whh_b": scale * jax.random.normal(ks[6], (H, 4 * H), jnp.float32),
        "b_b": (scale * jax.random.normal(ks[7], (1, 4 * H), jnp.float32)
                + scale * jax.random.normal(ks[8], (1, 4 * H), jnp.float32)),
    }


if __name__ == "__main__":
    VOCAB = 50
    TOKEN_EMBED_SIZE = 32     # token_embed_size
    TOKEN_ENCODING_SIZE = 32  # token_encoding_size -> H = 16 per direction
    B, T = 4, 8

    key = jax.random.PRNGKey(0)
    k_param, k_ids = jax.random.split(key)
    params = make_params(k_param, VOCAB, TOKEN_EMBED_SIZE, TOKEN_ENCODING_SIZE)

    lengths = jnp.array([8, 5, 7, 3], dtype=jnp.int32)           # variable code lengths
    token_ids = jax.random.randint(k_ids, (B, T), 1, VOCAB, dtype=jnp.int32)
    # zero-pad past each sequence's length (padding id = 0)
    pad_mask = (jnp.arange(T)[None, :] < lengths[:, None])
    token_ids = jnp.where(pad_mask, token_ids, 0)

    enc, (last_state, last_cell) = sequential_code_encoder(token_ids, lengths, params)
    jax.block_until_ready((enc, last_state, last_cell))

    assert enc.shape == (B, T, TOKEN_ENCODING_SIZE)
    assert last_state.shape == (B, TOKEN_ENCODING_SIZE)
    assert last_cell.shape == (B, TOKEN_ENCODING_SIZE)

    enc_ref, (ls_ref, lc_ref) = _reference(token_ids, lengths, params)
    np.testing.assert_allclose(np.asarray(enc), np.asarray(enc_ref), rtol=5e-2, atol=5e-2)
    np.testing.assert_allclose(np.asarray(last_state), np.asarray(ls_ref), rtol=5e-2, atol=5e-2)
    np.testing.assert_allclose(np.asarray(last_cell), np.asarray(lc_ref), rtol=5e-2, atol=5e-2)

    print("KERNEL_OK")
</pallas_src>

<mosaic_0001>
module attributes {stable_mosaic.version = 11 : i64} {
  func.func @_bilstm_kernel(%arg0: memref<8x4x32xbf16, #tpu.memory_space<vmem>>, %arg1: memref<4x1xi32, #tpu.memory_space<vmem>>, %arg2: memref<32x128xbf16, #tpu.memory_space<vmem>>, %arg3: memref<16x128xbf16, #tpu.memory_space<vmem>>, %arg4: memref<1x128xf32, #tpu.memory_space<vmem>>, %arg5: memref<8x4x32xf32, #tpu.memory_space<vmem>>, %arg6: memref<4x32xf32, #tpu.memory_space<vmem>>, %arg7: memref<4x32xf32, #tpu.memory_space<vmem>>, %arg8: memref<8x4x128xf32, #tpu.memory_space<vmem>>) attributes {dimension_semantics = [], scalar_prefetch = 0 : i64, scratch_operands = 1 : i64, tpu.core_type = #tpu.core_type<tc>} {
    %c0 = arith.constant 0 : index
    %c0_0 = arith.constant 0 : index
    %c0_1 = arith.constant 0 : index
    %0 = vector.load %arg0[%c0, %c0_0, %c0_1] : memref<8x4x32xbf16, #tpu.memory_space<vmem>>, vector<8x4x32xbf16>
    %1 = vector.shape_cast %0 : vector<8x4x32xbf16> to vector<32x32xbf16>
    %c0_2 = arith.constant 0 : index
    %c0_3 = arith.constant 0 : index
    %2 = vector.load %arg2[%c0_2, %c0_3] : memref<32x128xbf16, #tpu.memory_space<vmem>>, vector<32x128xbf16>
    %cst = arith.constant dense<0.000000e+00> : vector<32x128xf32>
    %3 = tpu.matmul %1, %2, %cst {dimension_numbers = #tpu.dot_dimension_numbers<[1], [0], [0], [1], [0, 0, 1, 1], [], []>} : vector<32x32xbf16>, vector<32x128xbf16>, vector<32x128xf32> -> vector<32x128xf32>
    %c0_4 = arith.constant 0 : index
    %c0_5 = arith.constant 0 : index
    %4 = vector.load %arg4[%c0_4, %c0_5] : memref<1x128xf32, #tpu.memory_space<vmem>>, vector<1x128xf32>
    %5 = vector.broadcast %4 : vector<1x128xf32> to vector<32x128xf32>
    %6 = arith.addf %3, %5 : vector<32x128xf32>
    %7 = vector.shape_cast %6 : vector<32x128xf32> to vector<8x4x128xf32>
    %c0_6 = arith.constant 0 : index
    %c0_7 = arith.constant 0 : index
    %c0_8 = arith.constant 0 : index
    %8 = vector.load %arg8[%c0_6, %c0_7, %c0_8] : memref<8x4x128xf32, #tpu.memory_space<vmem>>, vector<8x4x128xf32>
    tpu.vector_store %arg8[%c0_6, %c0_7, %c0_8], %7 {strides = array<i32>} : memref<8x4x128xf32, #tpu.memory_space<vmem>>, vector<8x4x128xf32>,
    %c0_9 = arith.constant 0 : index
    %c0_10 = arith.constant 0 : index
    %9 = vector.load %arg3[%c0_9, %c0_10] : memref<16x128xbf16, #tpu.memory_space<vmem>>, vector<16x128xbf16>
    %c0_11 = arith.constant 0 : index
    %c0_12 = arith.constant 0 : index
    %10 = vector.load %arg1[%c0_11, %c0_12] : memref<4x1xi32, #tpu.memory_space<vmem>>, vector<4x1xi32>
    %11 = tpu.concatenate %10, %10 in 0 : vector<4x1xi32>, vector<4x1xi32> -> vector<8x1xi32>
    %12 = tpu.iota {dimensions = array<i32: 0>} : vector<8x1xi32>
    %c4_i32 = arith.constant 4 : i32
    %13 = vector.broadcast %c4_i32 : i32 to vector<8x1xi32>
    %14 = arith.cmpi slt, %12, %13 : vector<8x1xi32>
    %cst_13 = arith.constant 0.000000e+00 : f32
    %15 = vector.broadcast %cst_13 : f32 to vector<8x16xf32>
    %c0_i32 = arith.constant 0 : i32
    %c7_i32 = arith.constant 7 : i32
    %16 = arith.subi %c7_i32, %c0_i32 : i32
    %17 = arith.truncf %15 : vector<8x16xf32> to vector<8x16xbf16>
    %cst_14 = arith.constant dense<0.000000e+00> : vector<8x128xf32>
    %18 = tpu.matmul %17, %9, %cst_14 {dimension_numbers = #tpu.dot_dimension_numbers<[1], [0], [0], [1], [0, 0, 1, 1], [], []>} : vector<8x16xbf16>, vector<16x128xbf16>, vector<8x128xf32> -> vector<8x128xf32>
    %19 = arith.index_cast %c0_i32 : i32 to index
    %c0_15 = arith.constant 0 : index
    %c0_16 = arith.constant 0 : index
    %20 = vector.load %arg8[%19, %c0_15, %c0_16] : memref<8x4x128xf32, #tpu.memory_space<vmem>>, vector<1x4x64xf32>
    %21 = vector.shape_cast %20 : vector<1x4x64xf32> to vector<4x64xf32>
    %22 = vector.extract_strided_slice %18 {offsets = [0, 0], sizes = [4, 64], strides = [1, 1]} : vector<8x128xf32> to vector<4x64xf32>
    %23 = arith.addf %21, %22 : vector<4x64xf32>
    %24 = arith.index_cast %16 : i32 to index
    %c0_17 = arith.constant 0 : index
    %c64 = arith.constant 64 : index
    %25 = vector.load %arg8[%24, %c0_17, %c64] : memref<8x4x128xf32, #tpu.memory_space<vmem>>, vector<1x4x64xf32>
    %26 = vector.shape_cast %25 : vector<1x4x64xf32> to vector<4x64xf32>
    %27 = vector.extract_strided_slice %18 {offsets = [4, 64], sizes = [4, 64], strides = [1, 1]} : vector<8x128xf32> to vector<4x64xf32>
    %28 = arith.addf %26, %27 : vector<4x64xf32>
    %29 = tpu.concatenate %23, %28 in 0 : vector<4x64xf32>, vector<4x64xf32> -> vector<8x64xf32>
    %30 = vector.extract_strided_slice %29 {offsets = [0, 0], sizes = [8, 16], strides = [1, 1]} : vector<8x64xf32> to vector<8x16xf32>
    %31 = arith.negf %30 : vector<8x16xf32>
    %32 = math.exp %31 : vector<8x16xf32>
    %cst_18 = arith.constant 1.000000e+00 : f32
    %33 = vector.broadcast %cst_18 : f32 to vector<8x16xf32>
    %34 = arith.addf %33, %32 : vector<8x16xf32>
    %35 = arith.divf %33, %34 : vector<8x16xf32>
    %36 = vector.extract_strided_slice %29 {offsets = [0, 16], sizes = [8, 16], strides = [1, 1]} : vector<8x64xf32> to vector<8x16xf32>
    %37 = arith.negf %36 : vector<8x16xf32>
    %38 = math.exp %37 : vector<8x16xf32>
    %cst_19 = arith.constant 1.000000e+00 : f32
    %39 = vector.broadcast %cst_19 : f32 to vector<8x16xf32>
    %40 = arith.addf %39, %38 : vector<8x16xf32>
    %41 = arith.divf %39, %40 : vector<8x16xf32>
    %42 = vector.extract_strided_slice %29 {offsets = [0, 32], sizes = [8, 16], strides = [1, 1]} : vector<8x64xf32> to vector<8x16xf32>
    %43 = math.tanh %42 : vector<8x16xf32>
    %44 = vector.extract_strided_slice %29 {offsets = [0, 48], sizes = [8, 16], strides = [1, 1]} : vector<8x64xf32> to vector<8x16xf32>
    %45 = arith.negf %44 : vector<8x16xf32>
    %46 = math.exp %45 : vector<8x16xf32>
    %cst_20 = arith.constant 1.000000e+00 : f32
    %47 = vector.broadcast %cst_20 : f32 to vector<8x16xf32>
    %48 = arith.addf %47, %46 : vector<8x16xf32>
    %49 = arith.divf %47, %48 : vector<8x16xf32>
    %50 = arith.mulf %41, %15 : vector<8x16xf32>
    %51 = arith.mulf %35, %43 : vector<8x16xf32>
    %52 = arith.addf %50, %51 : vector<8x16xf32>
    %53 = math.tanh %52 : vector<8x16xf32>
    %54 = arith.mulf %49, %53 : vector<8x16xf32>
    %55 = vector.broadcast %c0_i32 : i32 to vector<8x1xi32>
    %56 = vector.broadcast %16 : i32 to vector<8x1xi32>
    %57 = arith.select %14, %55, %56 : vector<8x1xi1>, vector<8x1xi32>
    %58 = arith.cmpi slt, %57, %11 : vector<8x1xi32>
    %59 = arith.extui %58 : vector<8x1xi1> to vector<8x1xi32>
    %60 = arith.sitofp %59 : vector<8x1xi32> to vector<8x1xf32>
    %61 = vector.broadcast %60 : vector<8x1xf32> to vector<8x16xf32>
    %62 = arith.mulf %61, %54 : vector<8x16xf32>
    %63 = vector.extract_strided_slice %62 {offsets = [0, 0], sizes = [4, 16], strides = [1, 1]} : vector<8x16xf32> to vector<4x16xf32>
    %64 = arith.index_cast %c0_i32 : i32 to index
    %c0_21 = arith.constant 0 : index
    %c0_22 = arith.constant 0 : index
    %65 = vector.load %arg5[%64, %c0_21, %c0_22] : memref<8x4x32xf32, #tpu.memory_space<vmem>>, vector<1x4x16xf32>
    %66 = vector.shape_cast %65 : vector<1x4x16xf32> to vector<4x16xf32>
    %67 = vector.shape_cast %63 : vector<4x16xf32> to vector<1x4x16xf32>
    tpu.vector_store %arg5[%64, %c0_21, %c0_22], %67 {strides = array<i32>} : memref<8x4x32xf32, #tpu.memory_space<vmem>>, vector<1x4x16xf32>,
    %68 = vector.extract_strided_slice %62 {offsets = [4, 0], sizes = [4, 16], strides = [1, 1]} : vector<8x16xf32> to vector<4x16xf32>
    %69 = arith.index_cast %16 : i32 to index
    %c0_23 = arith.constant 0 : index
    %c16 = arith.constant 16 : index
    %70 = vector.load %arg5[%69, %c0_23, %c16] : memref<8x4x32xf32, #tpu.memory_space<vmem>>, vector<1x4x16xf32>
    %71 = vector.shape_cast %70 : vector<1x4x16xf32> to vector<4x16xf32>
    %72 = vector.shape_cast %68 : vector<4x16xf32> to vector<1x4x16xf32>
    tpu.vector_store %arg5[%69, %c0_23, %c16], %72 {strides = array<i32>} : memref<8x4x32xf32, #tpu.memory_space<vmem>>, vector<1x4x16xf32>,
    %73 = arith.subf %54, %15 : vector<8x16xf32>
    %74 = vector.broadcast %60 : vector<8x1xf32> to vector<8x16xf32>
    %75 = arith.mulf %74, %73 : vector<8x16xf32>
    %76 = arith.addf %15, %75 : vector<8x16xf32>
    %77 = arith.subf %52, %15 : vector<8x16xf32>
    %78 = vector.broadcast %60 : vector<8x1xf32> to vector<8x16xf32>
    %79 = arith.mulf %78, %77 : vector<8x16xf32>
    %80 = arith.addf %15, %79 : vector<8x16xf32>
    %c1_i32 = arith.constant 1 : i32
    %c7_i32_24 = arith.constant 7 : i32
    %81 = arith.subi %c7_i32_24, %c1_i32 : i32
    %82 = arith.truncf %76 : vector<8x16xf32> to vector<8x16xbf16>
    %cst_25 = arith.constant dense<0.000000e+00> : vector<8x128xf32>
    %83 = tpu.matmul %82, %9, %cst_25 {dimension_numbers = #tpu.dot_dimension_numbers<[1], [0], [0], [1], [0, 0, 1, 1], [], []>} : vector<8x16xbf16>, vector<16x128xbf16>, vector<8x128xf32> -> vector<8x128xf32>
    %84 = arith.index_cast %c1_i32 : i32 to index
    %c0_26 = arith.constant 0 : index
    %c0_27 = arith.constant 0 : index
    %85 = vector.load %arg8[%84, %c0_26, %c0_27] : memref<8x4x128xf32, #tpu.memory_space<vmem>>, vector<1x4x64xf32>
    %86 = vector.shape_cast %85 : vector<1x4x64xf32> to vector<4x64xf32>
    %87 = vector.extract_strided_slice %83 {offsets = [0, 0], sizes = [4, 64], strides = [1, 1]} : vector<8x128xf32> to vector<4x64xf32>
    %88 = arith.addf %86, %87 : vector<4x64xf32>
    %89 = arith.index_cast %81 : i32 to index
    %c0_28 = arith.constant 0 : index
    %c64_29 = arith.constant 64 : index
    %90 = vector.load %arg8[%89, %c0_28, %c64_29] : memref<8x4x128xf32, #tpu.memory_space<vmem>>, vector<1x4x64xf32>
    %91 = vector.shape_cast %90 : vector<1x4x64xf32> to vector<4x64xf32>
    %92 = vector.extract_strided_slice %83 {offsets = [4, 64], sizes = [4, 64], strides = [1, 1]} : vector<8x128xf32> to vector<4x64xf32>
    %93 = arith.addf %91, %92 : vector<4x64xf32>
    %94 = tpu.concatenate %88, %93 in 0 : vector<4x64xf32>, vector<4x64xf32> -> vector<8x64xf32>
    %95 = vector.extract_strided_slice %94 {offsets = [0, 0], sizes = [8, 16], strides = [1, 1]} : vector<8x64xf32> to vector<8x16xf32>
    %96 = arith.negf %95 : vector<8x16xf32>
    %97 = math.exp %96 : vector<8x16xf32>
    %cst_30 = arith.constant 1.000000e+00 : f32
    %98 = vector.broadcast %cst_30 : f32 to vector<8x16xf32>
    %99 = arith.addf %98, %97 : vector<8x16xf32>
    %100 = arith.divf %98, %99 : vector<8x16xf32>
    %101 = vector.extract_strided_slice %94 {offsets = [0, 16], sizes = [8, 16], strides = [1, 1]} : vector<8x64xf32> to vector<8x16xf32>
    %102 = arith.negf %101 : vector<8x16xf32>
    %103 = math.exp %102 : vector<8x16xf32>
    %cst_31 = arith.constant 1.000000e+00 : f32
    %104 = vector.broadcast %cst_31 : f32 to vector<8x16xf32>
    %105 = arith.addf %104, %103 : vector<8x16xf32>
    %106 = arith.divf %104, %105 : vector<8x16xf32>
    %107 = vector.extract_strided_slice %94 {offsets = [0, 32], sizes = [8, 16], strides = [1, 1]} : vector<8x64xf32> to vector<8x16xf32>
    %108 = math.tanh %107 : vector<8x16xf32>
    %109 = vector.extract_strided_slice %94 {offsets = [0, 48], sizes = [8, 16], strides = [1, 1]} : vector<8x64xf32> to vector<8x16xf32>
    %110 = arith.negf %109 : vector<8x16xf32>
    %111 = math.exp %110 : vector<8x16xf32>
    %cst_32 = arith.constant 1.000000e+00 : f32
    %112 = vector.broadcast %cst_32 : f32 to vector<8x16xf32>
    %113 = arith.addf %112, %111 : vector<8x16xf32>
    %114 = arith.divf %112, %113 : vector<8x16xf32>
    %115 = arith.mulf %106, %80 : vector<8x16xf32>
    %116 = arith.mulf %100, %108 : vector<8x16xf32>
    %117 = arith.addf %115, %116 : vector<8x16xf32>
    %118 = math.tanh %117 : vector<8x16xf32>
    %119 = arith.mulf %114, %118 : vector<8x16xf32>
    %120 = vector.broadcast %c1_i32 : i32 to vector<8x1xi32>
    %121 = vector.broadcast %81 : i32 to vector<8x1xi32>
    %122 = arith.select %14, %120, %121 : vector<8x1xi1>, vector<8x1xi32>
    %123 = arith.cmpi slt, %122, %11 : vector<8x1xi32>
    %124 = arith.extui %123 : vector<8x1xi1> to vector<8x1xi32>
    %125 = arith.sitofp %124 : vector<8x1xi32> to vector<8x1xf32>
    %126 = vector.broadcast %125 : vector<8x1xf32> to vector<8x16xf32>
    %127 = arith.mulf %126, %119 : vector<8x16xf32>
    %128 = vector.extract_strided_slice %127 {offsets = [0, 0], sizes = [4, 16], strides = [1, 1]} : vector<8x16xf32> to vector<4x16xf32>
    %129 = arith.index_cast %c1_i32 : i32 to index
    %c0_33 = arith.constant 0 : index
    %c0_34 = arith.constant 0 : index
    %130 = vector.load %arg5[%129, %c0_33, %c0_34] : memref<8x4x32xf32, #tpu.memory_space<vmem>>, vector<1x4x16xf32>
    %131 = vector.shape_cast %130 : vector<1x4x16xf32> to vector<4x16xf32>
    %132 = vector.shape_cast %128 : vector<4x16xf32> to vector<1x4x16xf32>
    tpu.vector_store %arg5[%129, %c0_33, %c0_34], %132 {strides = array<i32>} : memref<8x4x32xf32, #tpu.memory_space<vmem>>, vector<1x4x16xf32>,
    %133 = vector.extract_strided_slice %127 {offsets = [4, 0], sizes = [4, 16], strides = [1, 1]} : vector<8x16xf32> to vector<4x16xf32>
    %134 = arith.index_cast %81 : i32 to index
    %c0_35 = arith.constant 0 : index
    %c16_36 = arith.constant 16 : index
    %135 = vector.load %arg5[%134, %c0_35, %c16_36] : memref<8x4x32xf32, #tpu.memory_space<vmem>>, vector<1x4x16xf32>
    %136 = vector.shape_cast %135 : vector<1x4x16xf32> to vector<4x16xf32>
    %137 = vector.shape_cast %133 : vector<4x16xf32> to vector<1x4x16xf32>
    tpu.vector_store %arg5[%134, %c0_35, %c16_36], %137 {strides = array<i32>} : memref<8x4x32xf32, #tpu.memory_space<vmem>>, vector<1x4x16xf32>,
    %138 = arith.subf %119, %76 : vector<8x16xf32>
    %139 = vector.broadcast %125 : vector<8x1xf32> to vector<8x16xf32>
    %140 = arith.mulf %139, %138 : vector<8x16xf32>
    %141 = arith.addf %76, %140 : vector<8x16xf32>
    %142 = arith.subf %117, %80 : vector<8x16xf32>
    %143 = vector.broadcast %125 : vector<8x1xf32> to vector<8x16xf32>
    %144 = arith.mulf %143, %142 : vector<8x16xf32>
    %145 = arith.addf %80, %144 : vector<8x16xf32>
    %c2_i32 = arith.constant 2 : i32
    %c7_i32_37 = arith.constant 7 : i32
    %146 = arith.subi %c7_i32_37, %c2_i32 : i32
    %147 = arith.truncf %141 : vector<8x16xf32> to vector<8x16xbf16>
    %cst_38 = arith.constant dense<0.000000e+00> : vector<8x128xf32>
    %148 = tpu.matmul %147, %9, %cst_38 {dimension_numbers = #tpu.dot_dimension_numbers<[1], [0], [0], [1], [0, 0, 1, 1], [], []>} : vector<8x16xbf16>, vector<16x128xbf16>, vector<8x128xf32> -> vector<8x128xf32>
    %149 = arith.index_cast %c2_i32 : i32 to index
    %c0_39 = arith.constant 0 : index
    %c0_40 = arith.constant 0 : index
    %150 = vector.load %arg8[%149, %c0_39, %c0_40] : memref<8x4x128xf32, #tpu.memory_space<vmem>>, vector<1x4x64xf32>
    %151 = vector.shape_cast %150 : vector<1x4x64xf32> to vector<4x64xf32>
    %152 = vector.extract_strided_slice %148 {offsets = [0, 0], sizes = [4, 64], strides = [1, 1]} : vector<8x128xf32> to vector<4x64xf32>
    %153 = arith.addf %151, %152 : vector<4x64xf32>
    %154 = arith.index_cast %146 : i32 to index
    %c0_41 = arith.constant 0 : index
    %c64_42 = arith.constant 64 : index
    %155 = vector.load %arg8[%154, %c0_41, %c64_42] : memref<8x4x128xf32, #tpu.memory_space<vmem>>, vector<1x4x64xf32>
    %156 = vector.shape_cast %155 : vector<1x4x64xf32> to vector<4x64xf32>
    %157 = vector.extract_strided_slice %148 {offsets = [4, 64], sizes = [4, 64], strides = [1, 1]} : vector<8x128xf32> to vector<4x64xf32>
    %158 = arith.addf %156, %157 : vector<4x64xf32>
    %159 = tpu.concatenate %153, %158 in 0 : vector<4x64xf32>, vector<4x64xf32> -> vector<8x64xf32>
    %160 = vector.extract_strided_slice %159 {offsets = [0, 0], sizes = [8, 16], strides = [1, 1]} : vector<8x64xf32> to vector<8x16xf32>
    %161 = arith.negf %160 : vector<8x16xf32>
    %162 = math.exp %161 : vector<8x16xf32>
    %cst_43 = arith.constant 1.000000e+00 : f32
    %163 = vector.broadcast %cst_43 : f32 to vector<8x16xf32>
    %164 = arith.addf %163, %162 : vector<8x16xf32>
    %165 = arith.divf %163, %164 : vector<8x16xf32>
    %166 = vector.extract_strided_slice %159 {offsets = [0, 16], sizes = [8, 16], strides = [1, 1]} : vector<8x64xf32> to vector<8x16xf32>
    %167 = arith.negf %166 : vector<8x16xf32>
    %168 = math.exp %167 : vector<8x16xf32>
    %cst_44 = arith.constant 1.000000e+00 : f32
    %169 = vector.broadcast %cst_44 : f32 to vector<8x16xf32>
    %170 = arith.addf %169, %168 : vector<8x16xf32>
    %171 = arith.divf %169, %170 : vector<8x16xf32>
    %172 = vector.extract_strided_slice %159 {offsets = [0, 32], sizes = [8, 16], strides = [1, 1]} : vector<8x64xf32> to vector<8x16xf32>
    %173 = math.tanh %172 : vector<8x16xf32>
    %174 = vector.extract_strided_slice %159 {offsets = [0, 48], sizes = [8, 16], strides = [1, 1]} : vector<8x64xf32> to vector<8x16xf32>
    %175 = arith.negf %174 : vector<8x16xf32>
    %176 = math.exp %175 : vector<8x16xf32>
    %cst_45 = arith.constant 1.000000e+00 : f32
    %177 = vector.broadcast %cst_45 : f32 to vector<8x16xf32>
    %178 = arith.addf %177, %176 : vector<8x16xf32>
    %179 = arith.divf %177, %178 : vector<8x16xf32>
    %180 = arith.mulf %171, %145 : vector<8x16xf32>
    %181 = arith.mulf %165, %173 : vector<8x16xf32>
    %182 = arith.addf %180, %181 : vector<8x16xf32>
    %183 = math.tanh %182 : vector<8x16xf32>
    %184 = arith.mulf %179, %183 : vector<8x16xf32>
    %185 = vector.broadcast %c2_i32 : i32 to vector<8x1xi32>
    %186 = vector.broadcast %146 : i32 to vector<8x1xi32>
    %187 = arith.select %14, %185, %186 : vector<8x1xi1>, vector<8x1xi32>
    %188 = arith.cmpi slt, %187, %11 : vector<8x1xi32>
    %189 = arith.extui %188 : vector<8x1xi1> to vector<8x1xi32>
    %190 = arith.sitofp %189 : vector<8x1xi32> to vector<8x1xf32>
    %191 = vector.broadcast %190 : vector<8x1xf32> to vector<8x16xf32>
    %192 = arith.mulf %191, %184 : vector<8x16xf32>
    %193 = vector.extract_strided_slice %192 {offsets = [0, 0], sizes = [4, 16], strides = [1, 1]} : vector<8x16xf32> to vector<4x16xf32>
    %194 = arith.index_cast %c2_i32 : i32 to index
    %c0_46 = arith.constant 0 : index
    %c0_47 = arith.constant 0 : index
    %195 = vector.load %arg5[%194, %c0_46, %c0_47] : memref<8x4x32xf32, #tpu.memory_space<vmem>>, vector<1x4x16xf32>
    %196 = vector.shape_cast %195 : vector<1x4x16xf32> to vector<4x16xf32>
    %197 = vector.shape_cast %193 : vector<4x16xf32> to vector<1x4x16xf32>
    tpu.vector_store %arg5[%194, %c0_46, %c0_47], %197 {strides = array<i32>} : memref<8x4x32xf32, #tpu.memory_space<vmem>>, vector<1x4x16xf32>,
    %198 = vector.extract_strided_slice %192 {offsets = [4, 0], sizes = [4, 16], strides = [1, 1]} : vector<8x16xf32> to vector<4x16xf32>
    %199 = arith.index_cast %146 : i32 to index
    %c0_48 = arith.constant 0 : index
    %c16_49 = arith.constant 16 : index
    %200 = vector.load %arg5[%199, %c0_48, %c16_49] : memref<8x4x32xf32, #tpu.memory_space<vmem>>, vector<1x4x16xf32>
    %201 = vector.shape_cast %200 : vector<1x4x16xf32> to vector<4x16xf32>
    %202 = vector.shape_cast %198 : vector<4x16xf32> to vector<1x4x16xf32>
    tpu.vector_store %arg5[%199, %c0_48, %c16_49], %202 {strides = array<i32>} : memref<8x4x32xf32, #tpu.memory_space<vmem>>, vector<1x4x16xf32>,
    %203 = arith.subf %184, %141 : vector<8x16xf32>
    %204 = vector.broadcast %190 : vector<8x1xf32> to vector<8x16xf32>
    %205 = arith.mulf %204, %203 : vector<8x16xf32>
    %206 = arith.addf %141, %205 : vector<8x16xf32>
    %207 = arith.subf %182, %145 : vector<8x16xf32>
    %208 = vector.broadcast %190 : vector<8x1xf32> to vector<8x16xf32>
    %209 = arith.mulf %208, %207 : vector<8x16xf32>
    %210 = arith.addf %145, %209 : vector<8x16xf32>
    %c3_i32 = arith.constant 3 : i32
    %c7_i32_50 = arith.constant 7 : i32
    %211 = arith.subi %c7_i32_50, %c3_i32 : i32
    %212 = arith.truncf %206 : vector<8x16xf32> to vector<8x16xbf16>
    %cst_51 = arith.constant dense<0.000000e+00> : vector<8x128xf32>
    %213 = tpu.matmul %212, %9, %cst_51 {dimension_numbers = #tpu.dot_dimension_numbers<[1], [0], [0], [1], [0, 0, 1, 1], [], []>} : vector<8x16xbf16>, vector<16x128xbf16>, vector<8x128xf32> -> vector<8x128xf32>
    %214 = arith.index_cast %c3_i32 : i32 to index
    %c0_52 = arith.constant 0 : index
    %c0_53 = arith.constant 0 : index
    %215 = vector.load %arg8[%214, %c0_52, %c0_53] : memref<8x4x128xf32, #tpu.memory_space<vmem>>, vector<1x4x64xf32>
    %216 = vector.shape_cast %215 : vector<1x4x64xf32> to vector<4x64xf32>
    %217 = vector.extract_strided_slice %213 {offsets = [0, 0], sizes = [4, 64], strides = [1, 1]} : vector<8x128xf32> to vector<4x64xf32>
    %218 = arith.addf %216, %217 : vector<4x64xf32>
    %219 = arith.index_cast %211 : i32 to index
    %c0_54 = arith.constant 0 : index
    %c64_55 = arith.constant 64 : index
    %220 = vector.load %arg8[%219, %c0_54, %c64_55] : memref<8x4x128xf32, #tpu.memory_space<vmem>>, vector<1x4x64xf32>
    %221 = vector.shape_cast %220 : vector<1x4x64xf32> to vector<4x64xf32>
    %222 = vector.extract_strided_slice %213 {offsets = [4, 64], sizes = [4, 64], strides = [1, 1]} : vector<8x128xf32> to vector<4x64xf32>
    %223 = arith.addf %221, %222 : vector<4x64xf32>
    %224 = tpu.concatenate %218, %223 in 0 : vector<4x64xf32>, vector<4x64xf32> -> vector<8x64xf32>
    %225 = vector.extract_strided_slice %224 {offsets = [0, 0], sizes = [8, 16], strides = [1, 1]} : vector<8x64xf32> to vector<8x16xf32>
    %226 = arith.negf %225 : vector<8x16xf32>
    %227 = math.exp %226 : vector<8x16xf32>
    %cst_56 = arith.constant 1.000000e+00 : f32
    %228 = vector.broadcast %cst_56 : f32 to vector<8x16xf32>
    %229 = arith.addf %228, %227 : vector<8x16xf32>
    %230 = arith.divf %228, %229 : vector<8x16xf32>
    %231 = vector.extract_strided_slice %224 {offsets = [0, 16], sizes = [8, 16], strides = [1, 1]} : vector<8x64xf32> to vector<8x16xf32>
    %232 = arith.negf %231 : vector<8x16xf32>
    %233 = math.exp %232 : vector<8x16xf32>
    %cst_57 = arith.constant 1.000000e+00 : f32
    %234 = vector.broadcast %cst_57 : f32 to vector<8x16xf32>
    %235 = arith.addf %234, %233 : vector<8x16xf32>
    %236 = arith.divf %234, %235 : vector<8x16xf32>
    %237 = vector.extract_strided_slice %224 {offsets = [0, 32], sizes = [8, 16], strides = [1, 1]} : vector<8x64xf32> to vector<8x16xf32>
    %238 = math.tanh %237 : vector<8x16xf32>
    %239 = vector.extract_strided_slice %224 {offsets = [0, 48], sizes = [8, 16], strides = [1, 1]} : vector<8x64xf32> to vector<8x16xf32>
    %240 = arith.negf %239 : vector<8x16xf32>
    %241 = math.exp %240 : vector<8x16xf32>
    %cst_58 = arith.constant 1.000000e+00 : f32
    %242 = vector.broadcast %cst_58 : f32 to vector<8x16xf32>
    %243 = arith.addf %242, %241 : vector<8x16xf32>
    %244 = arith.divf %242, %243 : vector<8x16xf32>
    %245 = arith.mulf %236, %210 : vector<8x16xf32>
    %246 = arith.mulf %230, %238 : vector<8x16xf32>
    %247 = arith.addf %245, %246 : vector<8x16xf32>
    %248 = math.tanh %247 : vector<8x16xf32>
    %249 = arith.mulf %244, %248 : vector<8x16xf32>
    %250 = vector.broadcast %c3_i32 : i32 to vector<8x1xi32>
    %251 = vector.broadcast %211 : i32 to vector<8x1xi32>
    %252 = arith.select %14, %250, %251 : vector<8x1xi1>, vector<8x1xi32>
    %253 = arith.cmpi slt, %252, %11 : vector<8x1xi32>
    %254 = arith.extui %253 : vector<8x1xi1> to vector<8x1xi32>
    %255 = arith.sitofp %254 : vector<8x1xi32> to vector<8x1xf32>
    %256 = vector.broadcast %255 : vector<8x1xf32> to vector<8x16xf32>
    %257 = arith.mulf %256, %249 : vector<8x16xf32>
    %258 = vector.extract_strided_slice %257 {offsets = [0, 0], sizes = [4, 16], strides = [1, 1]} : vector<8x16xf32> to vector<4x16xf32>
    %259 = arith.index_cast %c3_i32 : i32 to index
    %c0_59 = arith.constant 0 : index
    %c0_60 = arith.constant 0 : index
    %260 = vector.load %arg5[%259, %c0_59, %c0_60] : memref<8x4x32xf32, #tpu.memory_space<vmem>>, vector<1x4x16xf32>
    %261 = vector.shape_cast %260 : vector<1x4x16xf32> to vector<4x16xf32>
    %262 = vector.shape_cast %258 : vector<4x16xf32> to vector<1x4x16xf32>
    tpu.vector_store %arg5[%259, %c0_59, %c0_60], %262 {strides = array<i32>} : memref<8x4x32xf32, #tpu.memory_space<vmem>>, vector<1x4x16xf32>,
    %263 = vector.extract_strided_slice %257 {offsets = [4, 0], sizes = [4, 16], strides = [1, 1]} : vector<8x16xf32> to vector<4x16xf32>
    %264 = arith.index_cast %211 : i32 to index
    %c0_61 = arith.constant 0 : index
    %c16_62 = arith.constant 16 : index
    %265 = vector.load %arg5[%264, %c0_61, %c16_62] : memref<8x4x32xf32, #tpu.memory_space<vmem>>, vector<1x4x16xf32>
    %266 = vector.shape_cast %265 : vector<1x4x16xf32> to vector<4x16xf32>
    %267 = vector.shape_cast %263 : vector<4x16xf32> to vector<1x4x16xf32>
    tpu.vector_store %arg5[%264, %c0_61, %c16_62], %267 {strides = array<i32>} : memref<8x4x32xf32, #tpu.memory_space<vmem>>, vector<1x4x16xf32>,
    %268 = arith.subf %249, %206 : vector<8x16xf32>
    %269 = vector.broadcast %255 : vector<8x1xf32> to vector<8x16xf32>
    %270 = arith.mulf %269, %268 : vector<8x16xf32>
    %271 = arith.addf %206, %270 : vector<8x16xf32>
    %272 = arith.subf %247, %210 : vector<8x16xf32>
    %273 = vector.broadcast %255 : vector<8x1xf32> to vector<8x16xf32>
    %274 = arith.mulf %273, %272 : vector<8x16xf32>
    %275 = arith.addf %210, %274 : vector<8x16xf32>
    %c4_i32_63 = arith.constant 4 : i32
    %c7_i32_64 = arith.constant 7 : i32
    %276 = arith.subi %c7_i32_64, %c4_i32_63 : i32
    %277 = arith.truncf %271 : vector<8x16xf32> to vector<8x16xbf16>
    %cst_65 = arith.constant dense<0.000000e+00> : vector<8x128xf32>
    %278 = tpu.matmul %277, %9, %cst_65 {dimension_numbers = #tpu.dot_dimension_numbers<[1], [0], [0], [1], [0, 0, 1, 1], [], []>} : vector<8x16xbf16>, vector<16x128xbf16>, vector<8x128xf32> -> vector<8x128xf32>
    %279 = arith.index_cast %c4_i32_63 : i32 to index
    %c0_66 = arith.constant 0 : index
    %c0_67 = arith.constant 0 : index
    %280 = vector.load %arg8[%279, %c0_66, %c0_67] : memref<8x4x128xf32, #tpu.memory_space<vmem>>, vector<1x4x64xf32>
    %281 = vector.shape_cast %280 : vector<1x4x64xf32> to vector<4x64xf32>
    %282 = vector.extract_strided_slice %278 {offsets = [0, 0], sizes = [4, 64], strides = [1, 1]} : vector<8x128xf32> to vector<4x64xf32>
    %283 = arith.addf %281, %282 : vector<4x64xf32>
    %284 = arith.index_cast %276 : i32 to index
    %c0_68 = arith.constant 0 : index
    %c64_69 = arith.constant 64 : index
    %285 = vector.load %arg8[%284, %c0_68, %c64_69] : memref<8x4x128xf32, #tpu.memory_space<vmem>>, vector<1x4x64xf32>
    %286 = vector.shape_cast %285 : vector<1x4x64xf32> to vector<4x64xf32>
    %287 = vector.extract_strided_slice %278 {offsets = [4, 64], sizes = [4, 64], strides = [1, 1]} : vector<8x128xf32> to vector<4x64xf32>
    %288 = arith.addf %286, %287 : vector<4x64xf32>
    %289 = tpu.concatenate %283, %288 in 0 : vector<4x64xf32>, vector<4x64xf32> -> vector<8x64xf32>
    %290 = vector.extract_strided_slice %289 {offsets = [0, 0], sizes = [8, 16], strides = [1, 1]} : vector<8x64xf32> to vector<8x16xf32>
    %291 = arith.negf %290 : vector<8x16xf32>
    %292 = math.exp %291 : vector<8x16xf32>
    %cst_70 = arith.constant 1.000000e+00 : f32
    %293 = vector.broadcast %cst_70 : f32 to vector<8x16xf32>
    %294 = arith.addf %293, %292 : vector<8x16xf32>
    %295 = arith.divf %293, %294 : vector<8x16xf32>
    %296 = vector.extract_strided_slice %289 {offsets = [0, 16], sizes = [8, 16], strides = [1, 1]} : vector<8x64xf32> to vector<8x16xf32>
    %297 = arith.negf %296 : vector<8x16xf32>
    %298 = math.exp %297 : vector<8x16xf32>
    %cst_71 = arith.constant 1.000000e+00 : f32
    %299 = vector.broadcast %cst_71 : f32 to vector<8x16xf32>
    %300 = arith.addf %299, %298 : vector<8x16xf32>
    %301 = arith.divf %299, %300 : vector<8x16xf32>
    %302 = vector.extract_strided_slice %289 {offsets = [0, 32], sizes = [8, 16], strides = [1, 1]} : vector<8x64xf32> to vector<8x16xf32>
    %303 = math.tanh %302 : vector<8x16xf32>
    %304 = vector.extract_strided_slice %289 {offsets = [0, 48], sizes = [8, 16], strides = [1, 1]} : vector<8x64xf32> to vector<8x16xf32>
    %305 = arith.negf %304 : vector<8x16xf32>
    %306 = math.exp %305 : vector<8x16xf32>
    %cst_72 = arith.constant 1.000000e+00 : f32
    %307 = vector.broadcast %cst_72 : f32 to vector<8x16xf32>
    %308 = arith.addf %307, %306 : vector<8x16xf32>
    %309 = arith.divf %307, %308 : vector<8x16xf32>
    %310 = arith.mulf %301, %275 : vector<8x16xf32>
    %311 = arith.mulf %295, %303 : vector<8x16xf32>
    %312 = arith.addf %310, %311 : vector<8x16xf32>
    %313 = math.tanh %312 : vector<8x16xf32>
    %314 = arith.mulf %309, %313 : vector<8x16xf32>
    %315 = vector.broadcast %c4_i32_63 : i32 to vector<8x1xi32>
    %316 = vector.broadcast %276 : i32 to vector<8x1xi32>
    %317 = arith.select %14, %315, %316 : vector<8x1xi1>, vector<8x1xi32>
    %318 = arith.cmpi slt, %317, %11 : vector<8x1xi32>
    %319 = arith.extui %318 : vector<8x1xi1> to vector<8x1xi32>
    %320 = arith.sitofp %319 : vector<8x1xi32> to vector<8x1xf32>
    %321 = vector.broadcast %320 : vector<8x1xf32> to vector<8x16xf32>
    %322 = arith.mulf %321, %314 : vector<8x16xf32>
    %323 = vector.extract_strided_slice %322 {offsets = [0, 0], sizes = [4, 16], strides = [1, 1]} : vector<8x16xf32> to vector<4x16xf32>
    %324 = arith.index_cast %c4_i32_63 : i32 to index
    %c0_73 = arith.constant 0 : index
    %c0_74 = arith.constant 0 : index
    %325 = vector.load %arg5[%324, %c0_73, %c0_74] : memref<8x4x32xf32, #tpu.memory_space<vmem>>, vector<1x4x16xf32>
    %326 = vector.shape_cast %325 : vector<1x4x16xf32> to vector<4x16xf32>
    %327 = vector.shape_cast %323 : vector<4x16xf32> to vector<1x4x16xf32>
    tpu.vector_store %arg5[%324, %c0_73, %c0_74], %327 {strides = array<i32>} : memref<8x4x32xf32, #tpu.memory_space<vmem>>, vector<1x4x16xf32>,
    %328 = vector.extract_strided_slice %322 {offsets = [4, 0], sizes = [4, 16], strides = [1, 1]} : vector<8x16xf32> to vector<4x16xf32>
    %329 = arith.index_cast %276 : i32 to index
    %c0_75 = arith.constant 0 : index
    %c16_76 = arith.constant 16 : index
    %330 = vector.load %arg5[%329, %c0_75, %c16_76] : memref<8x4x32xf32, #tpu.memory_space<vmem>>, vector<1x4x16xf32>
    %331 = vector.shape_cast %330 : vector<1x4x16xf32> to vector<4x16xf32>
    %332 = vector.shape_cast %328 : vector<4x16xf32> to vector<1x4x16xf32>
    tpu.vector_store %arg5[%329, %c0_75, %c16_76], %332 {strides = array<i32>} : memref<8x4x32xf32, #tpu.memory_space<vmem>>, vector<1x4x16xf32>,
    %333 = arith.subf %314, %271 : vector<8x16xf32>
    %334 = vector.broadcast %320 : vector<8x1xf32> to vector<8x16xf32>
    %335 = arith.mulf %334, %333 : vector<8x16xf32>
    %336 = arith.addf %271, %335 : vector<8x16xf32>
    %337 = arith.subf %312, %275 : vector<8x16xf32>
    %338 = vector.broadcast %320 : vector<8x1xf32> to vector<8x16xf32>
    %339 = arith.mulf %338, %337 : vector<8x16xf32>
    %340 = arith.addf %275, %339 : vector<8x16xf32>
    %c5_i32 = arith.constant 5 : i32
    %c7_i32_77 = arith.constant 7 : i32
    %341 = arith.subi %c7_i32_77, %c5_i32 : i32
    %342 = arith.truncf %336 : vector<8x16xf32> to vector<8x16xbf16>
    %cst_78 = arith.constant dense<0.000000e+00> : vector<8x128xf32>
    %343 = tpu.matmul %342, %9, %cst_78 {dimension_numbers = #tpu.dot_dimension_numbers<[1], [0], [0], [1], [0, 0, 1, 1], [], []>} : vector<8x16xbf16>, vector<16x128xbf16>, vector<8x128xf32> -> vector<8x128xf32>
    %344 = arith.index_cast %c5_i32 : i32 to index
    %c0_79 = arith.constant 0 : index
    %c0_80 = arith.constant 0 : index
    %345 = vector.load %arg8[%344, %c0_79, %c0_80] : memref<8x4x128xf32, #tpu.memory_space<vmem>>, vector<1x4x64xf32>
    %346 = vector.shape_cast %345 : vector<1x4x64xf32> to vector<4x64xf32>
    %347 = vector.extract_strided_slice %343 {offsets = [0, 0], sizes = [4, 64], strides = [1, 1]} : vector<8x128xf32> to vector<4x64xf32>
    %348 = arith.addf %346, %347 : vector<4x64xf32>
    %349 = arith.index_cast %341 : i32 to index
    %c0_81 = arith.constant 0 : index
    %c64_82 = arith.constant 64 : index
    %350 = vector.load %arg8[%349, %c0_81, %c64_82] : memref<8x4x128xf32, #tpu.memory_space<vmem>>, vector<1x4x64xf32>
    %351 = vector.shape_cast %350 : vector<1x4x64xf32> to vector<4x64xf32>
    %352 = vector.extract_strided_slice %343 {offsets = [4, 64], sizes = [4, 64], strides = [1, 1]} : vector<8x128xf32> to vector<4x64xf32>
    %353 = arith.addf %351, %352 : vector<4x64xf32>
    %354 = tpu.concatenate %348, %353 in 0 : vector<4x64xf32>, vector<4x64xf32> -> vector<8x64xf32>
    %355 = vector.extract_strided_slice %354 {offsets = [0, 0], sizes = [8, 16], strides = [1, 1]} : vector<8x64xf32> to vector<8x16xf32>
    %356 = arith.negf %355 : vector<8x16xf32>
    %357 = math.exp %356 : vector<8x16xf32>
    %cst_83 = arith.constant 1.000000e+00 : f32
    %358 = vector.broadcast %cst_83 : f32 to vector<8x16xf32>
    %359 = arith.addf %358, %357 : vector<8x16xf32>
    %360 = arith.divf %358, %359 : vector<8x16xf32>
    %361 = vector.extract_strided_slice %354 {offsets = [0, 16], sizes = [8, 16], strides = [1, 1]} : vector<8x64xf32> to vector<8x16xf32>
    %362 = arith.negf %361 : vector<8x16xf32>
    %363 = math.exp %362 : vector<8x16xf32>
    %cst_84 = arith.constant 1.000000e+00 : f32
    %364 = vector.broadcast %cst_84 : f32 to vector<8x16xf32>
    %365 = arith.addf %364, %363 : vector<8x16xf32>
    %366 = arith.divf %364, %365 : vector<8x16xf32>
    %367 = vector.extract_strided_slice %354 {offsets = [0, 32], sizes = [8, 16], strides = [1, 1]} : vector<8x64xf32> to vector<8x16xf32>
    %368 = math.tanh %367 : vector<8x16xf32>
    %369 = vector.extract_strided_slice %354 {offsets = [0, 48], sizes = [8, 16], strides = [1, 1]} : vector<8x64xf32> to vector<8x16xf32>
    %370 = arith.negf %369 : vector<8x16xf32>
    %371 = math.exp %370 : vector<8x16xf32>
    %cst_85 = arith.constant 1.000000e+00 : f32
    %372 = vector.broadcast %cst_85 : f32 to vector<8x16xf32>
    %373 = arith.addf %372, %371 : vector<8x16xf32>
    %374 = arith.divf %372, %373 : vector<8x16xf32>
    %375 = arith.mulf %366, %340 : vector<8x16xf32>
    %376 = arith.mulf %360, %368 : vector<8x16xf32>
    %377 = arith.addf %375, %376 : vector<8x16xf32>
    %378 = math.tanh %377 : vector<8x16xf32>
    %379 = arith.mulf %374, %378 : vector<8x16xf32>
    %380 = vector.broadcast %c5_i32 : i32 to vector<8x1xi32>
    %381 = vector.broadcast %341 : i32 to vector<8x1xi32>
    %382 = arith.select %14, %380, %381 : vector<8x1xi1>, vector<8x1xi32>
    %383 = arith.cmpi slt, %382, %11 : vector<8x1xi32>
    %384 = arith.extui %383 : vector<8x1xi1> to vector<8x1xi32>
    %385 = arith.sitofp %384 : vector<8x1xi32> to vector<8x1xf32>
    %386 = vector.broadcast %385 : vector<8x1xf32> to vector<8x16xf32>
    %387 = arith.mulf %386, %379 : vector<8x16xf32>
    %388 = vector.extract_strided_slice %387 {offsets = [0, 0], sizes = [4, 16], strides = [1, 1]} : vector<8x16xf32> to vector<4x16xf32>
    %389 = arith.index_cast %c5_i32 : i32 to index
    %c0_86 = arith.constant 0 : index
    %c0_87 = arith.constant 0 : index
    %390 = vector.load %arg5[%389, %c0_86, %c0_87] : memref<8x4x32xf32, #tpu.memory_space<vmem>>, vector<1x4x16xf32>
    %391 = vector.shape_cast %390 : vector<1x4x16xf32> to vector<4x16xf32>
    %392 = vector.shape_cast %388 : vector<4x16xf32> to vector<1x4x16xf32>
    tpu.vector_store %arg5[%389, %c0_86, %c0_87], %392 {strides = array<i32>} : memref<8x4x32xf32, #tpu.memory_space<vmem>>, vector<1x4x16xf32>,
    %393 = vector.extract_strided_slice %387 {offsets = [4, 0], sizes = [4, 16], strides = [1, 1]} : vector<8x16xf32> to vector<4x16xf32>
    %394 = arith.index_cast %341 : i32 to index
    %c0_88 = arith.constant 0 : index
    %c16_89 = arith.constant 16 : index
    %395 = vector.load %arg5[%394, %c0_88, %c16_89] : memref<8x4x32xf32, #tpu.memory_space<vmem>>, vector<1x4x16xf32>
    %396 = vector.shape_cast %395 : vector<1x4x16xf32> to vector<4x16xf32>
    %397 = vector.shape_cast %393 : vector<4x16xf32> to vector<1x4x16xf32>
    tpu.vector_store %arg5[%394, %c0_88, %c16_89], %397 {strides = array<i32>} : memref<8x4x32xf32, #tpu.memory_space<vmem>>, vector<1x4x16xf32>,
    %398 = arith.subf %379, %336 : vector<8x16xf32>
    %399 = vector.broadcast %385 : vector<8x1xf32> to vector<8x16xf32>
    %400 = arith.mulf %399, %398 : vector<8x16xf32>
    %401 = arith.addf %336, %400 : vector<8x16xf32>
    %402 = arith.subf %377, %340 : vector<8x16xf32>
    %403 = vector.broadcast %385 : vector<8x1xf32> to vector<8x16xf32>
    %404 = arith.mulf %403, %402 : vector<8x16xf32>
    %405 = arith.addf %340, %404 : vector<8x16xf32>
    %c6_i32 = arith.constant 6 : i32
    %c7_i32_90 = arith.constant 7 : i32
    %406 = arith.subi %c7_i32_90, %c6_i32 : i32
    %407 = arith.truncf %401 : vector<8x16xf32> to vector<8x16xbf16>
    %cst_91 = arith.constant dense<0.000000e+00> : vector<8x128xf32>
    %408 = tpu.matmul %407, %9, %cst_91 {dimension_numbers = #tpu.dot_dimension_numbers<[1], [0], [0], [1], [0, 0, 1, 1], [], []>} : vector<8x16xbf16>, vector<16x128xbf16>, vector<8x128xf32> -> vector<8x128xf32>
    %409 = arith.index_cast %c6_i32 : i32 to index
    %c0_92 = arith.constant 0 : index
    %c0_93 = arith.constant 0 : index
    %410 = vector.load %arg8[%409, %c0_92, %c0_93] : memref<8x4x128xf32, #tpu.memory_space<vmem>>, vector<1x4x64xf32>
    %411 = vector.shape_cast %410 : vector<1x4x64xf32> to vector<4x64xf32>
    %412 = vector.extract_strided_slice %408 {offsets = [0, 0], sizes = [4, 64], strides = [1, 1]} : vector<8x128xf32> to vector<4x64xf32>
    %413 = arith.addf %411, %412 : vector<4x64xf32>
    %414 = arith.index_cast %406 : i32 to index
    %c0_94 = arith.constant 0 : index
    %c64_95 = arith.constant 64 : index
    %415 = vector.load %arg8[%414, %c0_94, %c64_95] : memref<8x4x128xf32, #tpu.memory_space<vmem>>, vector<1x4x64xf32>
    %416 = vector.shape_cast %415 : vector<1x4x64xf32> to vector<4x64xf32>
    %417 = vector.extract_strided_slice %408 {offsets = [4, 64], sizes = [4, 64], strides = [1, 1]} : vector<8x128xf32> to vector<4x64xf32>
    %418 = arith.addf %416, %417 : vector<4x64xf32>
    %419 = tpu.concatenate %413, %418 in 0 : vector<4x64xf32>, vector<4x64xf32> -> vector<8x64xf32>
    %420 = vector.extract_strided_slice %419 {offsets = [0, 0], sizes = [8, 16], strides = [1, 1]} : vector<8x64xf32> to vector<8x16xf32>
    %421 = arith.negf %420 : vector<8x16xf32>
    %422 = math.exp %421 : vector<8x16xf32>
    %cst_96 = arith.constant 1.000000e+00 : f32
    %423 = vector.broadcast %cst_96 : f32 to vector<8x16xf32>
    %424 = arith.addf %423, %422 : vector<8x16xf32>
    %425 = arith.divf %423, %424 : vector<8x16xf32>
    %426 = vector.extract_strided_slice %419 {offsets = [0, 16], sizes = [8, 16], strides = [1, 1]} : vector<8x64xf32> to vector<8x16xf32>
    %427 = arith.negf %426 : vector<8x16xf32>
    %428 = math.exp %427 : vector<8x16xf32>
    %cst_97 = arith.constant 1.000000e+00 : f32
    %429 = vector.broadcast %cst_97 : f32 to vector<8x16xf32>
    %430 = arith.addf %429, %428 : vector<8x16xf32>
    %431 = arith.divf %429, %430 : vector<8x16xf32>
    %432 = vector.extract_strided_slice %419 {offsets = [0, 32], sizes = [8, 16], strides = [1, 1]} : vector<8x64xf32> to vector<8x16xf32>
    %433 = math.tanh %432 : vector<8x16xf32>
    %434 = vector.extract_strided_slice %419 {offsets = [0, 48], sizes = [8, 16], strides = [1, 1]} : vector<8x64xf32> to vector<8x16xf32>
    %435 = arith.negf %434 : vector<8x16xf32>
    %436 = math.exp %435 : vector<8x16xf32>
    %cst_98 = arith.constant 1.000000e+00 : f32
    %437 = vector.broadcast %cst_98 : f32 to vector<8x16xf32>
    %438 = arith.addf %437, %436 : vector<8x16xf32>
    %439 = arith.divf %437, %438 : vector<8x16xf32>
    %440 = arith.mulf %431, %405 : vector<8x16xf32>
    %441 = arith.mulf %425, %433 : vector<8x16xf32>
    %442 = arith.addf %440, %441 : vector<8x16xf32>
    %443 = math.tanh %442 : vector<8x16xf32>
    %444 = arith.mulf %439, %443 : vector<8x16xf32>
    %445 = vector.broadcast %c6_i32 : i32 to vector<8x1xi32>
    %446 = vector.broadcast %406 : i32 to vector<8x1xi32>
    %447 = arith.select %14, %445, %446 : vector<8x1xi1>, vector<8x1xi32>
    %448 = arith.cmpi slt, %447, %11 : vector<8x1xi32>
    %449 = arith.extui %448 : vector<8x1xi1> to vector<8x1xi32>
    %450 = arith.sitofp %449 : vector<8x1xi32> to vector<8x1xf32>
    %451 = vector.broadcast %450 : vector<8x1xf32> to vector<8x16xf32>
    %452 = arith.mulf %451, %444 : vector<8x16xf32>
    %453 = vector.extract_strided_slice %452 {offsets = [0, 0], sizes = [4, 16], strides = [1, 1]} : vector<8x16xf32> to vector<4x16xf32>
    %454 = arith.index_cast %c6_i32 : i32 to index
    %c0_99 = arith.constant 0 : index
    %c0_100 = arith.constant 0 : index
    %455 = vector.load %arg5[%454, %c0_99, %c0_100] : memref<8x4x32xf32, #tpu.memory_space<vmem>>, vector<1x4x16xf32>
    %456 = vector.shape_cast %455 : vector<1x4x16xf32> to vector<4x16xf32>
    %457 = vector.shape_cast %453 : vector<4x16xf32> to vector<1x4x16xf32>
    tpu.vector_store %arg5[%454, %c0_99, %c0_100], %457 {strides = array<i32>} : memref<8x4x32xf32, #tpu.memory_space<vmem>>, vector<1x4x16xf32>,
    %458 = vector.extract_strided_slice %452 {offsets = [4, 0], sizes = [4, 16], strides = [1, 1]} : vector<8x16xf32> to vector<4x16xf32>
    %459 = arith.index_cast %406 : i32 to index
    %c0_101 = arith.constant 0 : index
    %c16_102 = arith.constant 16 : index
    %460 = vector.load %arg5[%459, %c0_101, %c16_102] : memref<8x4x32xf32, #tpu.memory_space<vmem>>, vector<1x4x16xf32>
    %461 = vector.shape_cast %460 : vector<1x4x16xf32> to vector<4x16xf32>
    %462 = vector.shape_cast %458 : vector<4x16xf32> to vector<1x4x16xf32>
    tpu.vector_store %arg5[%459, %c0_101, %c16_102], %462 {strides = array<i32>} : memref<8x4x32xf32, #tpu.memory_space<vmem>>, vector<1x4x16xf32>,
    %463 = arith.subf %444, %401 : vector<8x16xf32>
    %464 = vector.broadcast %450 : vector<8x1xf32> to vector<8x16xf32>
    %465 = arith.mulf %464, %463 : vector<8x16xf32>
    %466 = arith.addf %401, %465 : vector<8x16xf32>
    %467 = arith.subf %442, %405 : vector<8x16xf32>
    %468 = vector.broadcast %450 : vector<8x1xf32> to vector<8x16xf32>
    %469 = arith.mulf %468, %467 : vector<8x16xf32>
    %470 = arith.addf %405, %469 : vector<8x16xf32>
    %c7_i32_103 = arith.constant 7 : i32
    %c7_i32_104 = arith.constant 7 : i32
    %471 = arith.subi %c7_i32_104, %c7_i32_103 : i32
    %472 = arith.truncf %466 : vector<8x16xf32> to vector<8x16xbf16>
    %cst_105 = arith.constant dense<0.000000e+00> : vector<8x128xf32>
    %473 = tpu.matmul %472, %9, %cst_105 {dimension_numbers = #tpu.dot_dimension_numbers<[1], [0], [0], [1], [0, 0, 1, 1], [], []>} : vector<8x16xbf16>, vector<16x128xbf16>, vector<8x128xf32> -> vector<8x128xf32>
    %474 = arith.index_cast %c7_i32_103 : i32 to index
    %c0_106 = arith.constant 0 : index
    %c0_107 = arith.constant 0 : index
    %475 = vector.load %arg8[%474, %c0_106, %c0_107] : memref<8x4x128xf32, #tpu.memory_space<vmem>>, vector<1x4x64xf32>
    %476 = vector.shape_cast %475 : vector<1x4x64xf32> to vector<4x64xf32>
    %477 = vector.extract_strided_slice %473 {offsets = [0, 0], sizes = [4, 64], strides = [1, 1]} : vector<8x128xf32> to vector<4x64xf32>
    %478 = arith.addf %476, %477 : vector<4x64xf32>
    %479 = arith.index_cast %471 : i32 to index
    %c0_108 = arith.constant 0 : index
    %c64_109 = arith.constant 64 : index
    %480 = vector.load %arg8[%479, %c0_108, %c64_109] : memref<8x4x128xf32, #tpu.memory_space<vmem>>, vector<1x4x64xf32>
    %481 = vector.shape_cast %480 : vector<1x4x64xf32> to vector<4x64xf32>
    %482 = vector.extract_strided_slice %473 {offsets = [4, 64], sizes = [4, 64], strides = [1, 1]} : vector<8x128xf32> to vector<4x64xf32>
    %483 = arith.addf %481, %482 : vector<4x64xf32>
    %484 = tpu.concatenate %478, %483 in 0 : vector<4x64xf32>, vector<4x64xf32> -> vector<8x64xf32>
    %485 = vector.extract_strided_slice %484 {offsets = [0, 0], sizes = [8, 16], strides = [1, 1]} : vector<8x64xf32> to vector<8x16xf32>
    %486 = arith.negf %485 : vector<8x16xf32>
    %487 = math.exp %486 : vector<8x16xf32>
    %cst_110 = arith.constant 1.000000e+00 : f32
    %488 = vector.broadcast %cst_110 : f32 to vector<8x16xf32>
    %489 = arith.addf %488, %487 : vector<8x16xf32>
    %490 = arith.divf %488, %489 : vector<8x16xf32>
    %491 = vector.extract_strided_slice %484 {offsets = [0, 16], sizes = [8, 16], strides = [1, 1]} : vector<8x64xf32> to vector<8x16xf32>
    %492 = arith.negf %491 : vector<8x16xf32>
    %493 = math.exp %492 : vector<8x16xf32>
    %cst_111 = arith.constant 1.000000e+00 : f32
    %494 = vector.broadcast %cst_111 : f32 to vector<8x16xf32>
    %495 = arith.addf %494, %493 : vector<8x16xf32>
    %496 = arith.divf %494, %495 : vector<8x16xf32>
    %497 = vector.extract_strided_slice %484 {offsets = [0, 32], sizes = [8, 16], strides = [1, 1]} : vector<8x64xf32> to vector<8x16xf32>
    %498 = math.tanh %497 : vector<8x16xf32>
    %499 = vector.extract_strided_slice %484 {offsets = [0, 48], sizes = [8, 16], strides = [1, 1]} : vector<8x64xf32> to vector<8x16xf32>
    %500 = arith.negf %499 : vector<8x16xf32>
    %501 = math.exp %500 : vector<8x16xf32>
    %cst_112 = arith.constant 1.000000e+00 : f32
    %502 = vector.broadcast %cst_112 : f32 to vector<8x16xf32>
    %503 = arith.addf %502, %501 : vector<8x16xf32>
    %504 = arith.divf %502, %503 : vector<8x16xf32>
    %505 = arith.mulf %496, %470 : vector<8x16xf32>
    %506 = arith.mulf %490, %498 : vector<8x16xf32>
    %507 = arith.addf %505, %506 : vector<8x16xf32>
    %508 = math.tanh %507 : vector<8x16xf32>
    %509 = arith.mulf %504, %508 : vector<8x16xf32>
    %510 = vector.broadcast %c7_i32_103 : i32 to vector<8x1xi32>
    %511 = vector.broadcast %471 : i32 to vector<8x1xi32>
    %512 = arith.select %14, %510, %511 : vector<8x1xi1>, vector<8x1xi32>
    %513 = arith.cmpi slt, %512, %11 : vector<8x1xi32>
    %514 = arith.extui %513 : vector<8x1xi1> to vector<8x1xi32>
    %515 = arith.sitofp %514 : vector<8x1xi32> to vector<8x1xf32>
    %516 = vector.broadcast %515 : vector<8x1xf32> to vector<8x16xf32>
    %517 = arith.mulf %516, %509 : vector<8x16xf32>
    %518 = vector.extract_strided_slice %517 {offsets = [0, 0], sizes = [4, 16], strides = [1, 1]} : vector<8x16xf32> to vector<4x16xf32>
    %519 = arith.index_cast %c7_i32_103 : i32 to index
    %c0_113 = arith.constant 0 : index
    %c0_114 = arith.constant 0 : index
    %520 = vector.load %arg5[%519, %c0_113, %c0_114] : memref<8x4x32xf32, #tpu.memory_space<vmem>>, vector<1x4x16xf32>
    %521 = vector.shape_cast %520 : vector<1x4x16xf32> to vector<4x16xf32>
    %522 = vector.shape_cast %518 : vector<4x16xf32> to vector<1x4x16xf32>
    tpu.vector_store %arg5[%519, %c0_113, %c0_114], %522 {strides = array<i32>} : memref<8x4x32xf32, #tpu.memory_space<vmem>>, vector<1x4x16xf32>,
    %523 = vector.extract_strided_slice %517 {offsets = [4, 0], sizes = [4, 16], strides = [1, 1]} : vector<8x16xf32> to vector<4x16xf32>
    %524 = arith.index_cast %471 : i32 to index
    %c0_115 = arith.constant 0 : index
    %c16_116 = arith.constant 16 : index
    %525 = vector.load %arg5[%524, %c0_115, %c16_116] : memref<8x4x32xf32, #tpu.memory_space<vmem>>, vector<1x4x16xf32>
    %526 = vector.shape_cast %525 : vector<1x4x16xf32> to vector<4x16xf32>
    %527 = vector.shape_cast %523 : vector<4x16xf32> to vector<1x4x16xf32>
    tpu.vector_store %arg5[%524, %c0_115, %c16_116], %527 {strides = array<i32>} : memref<8x4x32xf32, #tpu.memory_space<vmem>>, vector<1x4x16xf32>,
    %528 = arith.subf %509, %466 : vector<8x16xf32>
    %529 = vector.broadcast %515 : vector<8x1xf32> to vector<8x16xf32>
    %530 = arith.mulf %529, %528 : vector<8x16xf32>
    %531 = arith.addf %466, %530 : vector<8x16xf32>
    %532 = arith.subf %507, %470 : vector<8x16xf32>
    %533 = vector.broadcast %515 : vector<8x1xf32> to vector<8x16xf32>
    %534 = arith.mulf %533, %532 : vector<8x16xf32>
    %535 = arith.addf %470, %534 : vector<8x16xf32>
    %c8_i32 = arith.constant 8 : i32
    %536 = vector.extract_strided_slice %531 {offsets = [0, 0], sizes = [4, 16], strides = [1, 1]} : vector<8x16xf32> to vector<4x16xf32>
    %537 = vector.extract_strided_slice %531 {offsets = [4, 0], sizes = [4, 16], strides = [1, 1]} : vector<8x16xf32> to vector<4x16xf32>
    %538 = tpu.concatenate %536, %537 in 1 : vector<4x16xf32>, vector<4x16xf32> -> vector<4x32xf32>
    %c0_117 = arith.constant 0 : index
    %c0_118 = arith.constant 0 : index
    %539 = vector.load %arg6[%c0_117, %c0_118] : memref<4x32xf32, #tpu.memory_space<vmem>>, vector<4x32xf32>
    tpu.vector_store %arg6[%c0_117, %c0_118], %538 {strides = array<i32>} : memref<4x32xf32, #tpu.memory_space<vmem>>, vector<4x32xf32>,
    %540 = vector.extract_strided_slice %535 {offsets = [0, 0], sizes = [4, 16], strides = [1, 1]} : vector<8x16xf32> to vector<4x16xf32>
    %541 = vector.extract_strided_slice %535 {offsets = [4, 0], sizes = [4, 16], strides = [1, 1]} : vector<8x16xf32> to vector<4x16xf32>
    %542 = tpu.concatenate %540, %541 in 1 : vector<4x16xf32>, vector<4x16xf32> -> vector<4x32xf32>
    %c0_119 = arith.constant 0 : index
    %c0_120 = arith.constant 0 : index
    %543 = vector.load %arg7[%c0_119, %c0_120] : memref<4x32xf32, #tpu.memory_space<vmem>>, vector<4x32xf32>
    tpu.vector_store %arg7[%c0_119, %c0_120], %542 {strides = array<i32>} : memref<4x32xf32, #tpu.memory_space<vmem>>, vector<4x32xf32>,
    return
  }
}

</mosaic_0001>

<bundles_post_ra>
// kernel: tpu_custom_call.1
= control target key start
LH: loop header
LB: loop body
LE: loop exit
PB: predicated region body
PF: predicated region fallthrough
CT: control target
= control target key end

     0   :  { %13 = vsyncpa [#allocation4], 0  ;;  %s1632_s0 = inlined_call_operand.hbm [shape: bf16[8,4,32], index: 0, kind: input, shape index: {}]   ;;  %s1633_s1 = inlined_call_operand.vmem [shape: s32[4,1], index: 1, kind: input, shape index: {}]   ;;  %s1634_s2 = inlined_call_operand.hbm [shape: bf16[32,128], index: 2, kind: input, shape index: {}]   ;;  %s1635_s3 = inlined_call_operand.hbm [shape: bf16[16,128], index: 3, kind: input, shape index: {}]   ;;  %s1636_s4 = inlined_call_operand.vmem [shape: f32[1,128], index: 4, kind: input, shape index: {}]   ;;  %s1637_s5 = inlined_call_operand.hbm [shape: f32[8,4,32], index: 5, kind: output, shape index: {0}]   ;;  %s1638_s6 = inlined_call_operand.hbm [shape: f32[4,32], index: 6, kind: output, shape index: {1}]   ;;  %s1639_s7 = inlined_call_operand.hbm [shape: f32[4,32], index: 7, kind: output, shape index: {2}]  }
   0x1   :  { %14 = vsyncpa [#allocation7], 0 }
   0x2   :  { %15 = vsyncpa [#allocation5], 0  ;;  %s36_s26 = sshll.u32 %s1634_s2, 4  ;;  %s37_s26 = int_to_ptr.hbm [resolvable:$true] %s36_s26 }
   0x3   :  { %16 = vsyncpa [#allocation11], 0  ;;  %s1308_s27 = smov [#allocation6]   ;;  %s21_s8 = sshll.u32 %s1632_s0, 4  ;;  %s22_s8 = int_to_ptr.hbm [resolvable:$true] %s21_s8 }
   0x4   :  { %s38_s28 = sshll.u32 %s1308_s27, 4  ;;  %s1309_s9 = smov 64   ;;  %s39_s28 = int_to_ptr.vmem [resolvable:$true] %s38_s28 }
   0x5   :  { %s1310_s10 = smov 4   ;;  %s1311_s11 = smov [#allocation3]  }
   0x6   :  { %44 = dma.hbm_to_vmem [thread:$0]  %s37_s26, 256, %s39_s28, [#allocation7], %s1309_s9, %s1309_s9, %s1310_s10  }
   0x7   :  { %s23_s12 = sshll.u32 %s1311_s11, 4  ;;  %s1312_s2 = smov 32   ;;  %s24_s12 = int_to_ptr.vmem [resolvable:$true] %s23_s12 }
   0x8   :  { %s1313_s13 = smov 2   ;;  %s49_s16 = sshll.u32 %s1635_s3, 4  ;;  %s50_s16 = int_to_ptr.hbm [resolvable:$true] %s49_s16 }
   0x9   :  { %29 = dma.hbm_to_vmem [thread:$0]  %s22_s8, 256, %s24_s12, [#allocation4], %s1312_s2, %s1312_s2, %s1313_s13  }
   0xa   :  { %s1314_s0 = smov [#allocation8]  }
   0xb   :  { %s51_s17 = sshll.u32 %s1314_s0, 4  ;;  %s52_s17 = int_to_ptr.vmem [resolvable:$true] %s51_s17 }
   0xc   :  { %57 = dma.hbm_to_vmem [thread:$0]  %s50_s16, 128, %s52_s17, [#allocation7], %s1309_s9, %s1309_s9, %s1310_s10  }
   0xd   :  { %1300 = dma.done.wait [#allocation4], 256  }
   0xe   :  { %1301 = vsyncadd [#allocation4], 4294967040 }
   0xf   :  { %1302 = dma.done.wait [#allocation7], 384  }
  0x10   :  { %1303 = vsyncadd [#allocation7], 4294966912  ;;  %v1315_v0 = vmov 0   ;;  %v1063_v1 = vld [vmem:[#allocation6 + $0x8] sm:$0xff]  ;;  %v73_v2 = vld [vmem:[#allocation3] sm:$0x3]  ;;  %v176_v42 = vlaneseq }
  0x11   :  { %1088 = vset.pattern.permute.xlu2 %v1315_v0  ;;  %1089 = vset.pattern.permute.xlu1 %v1315_v0  ;;  %v74_v3 = vld [vmem:[#allocation3 + $0x2] sm:$0x3]  ;;  %v75_v4 = vld [vmem:[#allocation3 + $0x4] sm:$0x3]  ;;  %v1062_v5 = vld [vmem:[#allocation6] sm:$0xff]  ;;  %vm126_vm0 = vcmask 261120  }
  0x12   :  { %1090 = vset.pattern.permute.xlu0 %v1315_v0  ;;  %137 = vmatpush.bf16.msra.mxu0 %v1063_v1  ;;  %v76_v6 = vld [vmem:[#allocation3 + $0x6] sm:$0x3]  ;;  %90 = vst [vmem:[#allocation1] ss:$4 sm:$0xff] %v73_v2  ;;  %v77_v8 = vld [vmem:[#allocation3 + $0x8] sm:$0x3] }
  0x13   :  { %v1391_v7 = vld [vmem:[#allocation8] sm:$0xff]  ;;  %93 = vst [vmem:[#allocation1 + $0x1] ss:$4 sm:$0xff] %v74_v3  ;;  %v78_v9 = vld [vmem:[#allocation3 + $0xa] sm:$0x3]  ;;  %vm174_vm1 = vcmask 1043456  }
  0x14   :  { %96 = vst [vmem:[#allocation1 + $0x2] ss:$4 sm:$0xff] %v75_v4  ;;  %196 = vmatpush.bf16.msra.mxu1 %v1391_v7  ;;  %292 = vmatpush.bf16.msra.mxu2 %v1391_v7  ;;  %v79_v10 = vld [vmem:[#allocation3 + $0xc] sm:$0x3]  ;;  %v80_v11 = vld [vmem:[#allocation3 + $0xe] sm:$0x3] }
  0x15   :  { %99 = vst [vmem:[#allocation1 + $0x3] ss:$4 sm:$0xff] %v76_v6  ;;  %391 = vmatpush.bf16.msra.mxu3 %v1391_v7  ;;  %v1091_v15 = vld [vmem:[%s1636_s4] ss:$0 sm:$0xff]  ;;  %s1316_s4 = smov 96   ;;  %v1410_v44 = vshrl.u32 %v176_v42, 7 }
  0x16   :  { %138 = vmatpush.bf16.msra.mxu0 %v1062_v5  ;;  %102 = vst [vmem:[#allocation1 + $0x20] ss:$4 sm:$0xff] %v77_v8  ;;  %v172_v41 = vld [vmem:[%s1633_s1] sm:$0xf]  ;;  %v1317_v46 = vmov 7   ;;  %v1318_v49 = vmov 0.0  }
  0x17   :  { %197 = vmatmul.bf16.vlgmr.msra.gmra.mxu1 %v1315_v0  ;;  %105 = vst [vmem:[#allocation1 + $0x21] ss:$4 sm:$0xff] %v78_v9  ;;  %v173_v43 = vrot.slane %v172_v41, 4  ;;  %vm178_vm2 = vcmp.lt.s32.totalorder %v1410_v44, 4  ;;  %s1319_s1 = smov 16   ;;  %s1320_s21 = smov 80  }
  0x18   :  { %490 = vmatpush.bf16.msrb.mxu1 %v1391_v7  ;;  %589 = vmatpush.bf16.msrb.mxu2 %v1391_v7  ;;  %108 = vst [vmem:[#allocation1 + $0x22] ss:$4 sm:$0xff] %v79_v10  ;;  %v253_v47 = vsel %vm178_vm2, 0, %v1317_v46  ;;  %vm185_vm8 = vcmask 130048   ;;  %s1327_s22 = smov 112   ;;  %s1328_s23 = smov [#allocation10]  }
  0x19   :  { %684 = vmatpush.bf16.msrb.mxu3 %v1391_v7  ;;  %111 = vst [vmem:[#allocation1 + $0x23] ss:$4 sm:$0xff] %v80_v11  ;;  %v1413_v45 = vsel %vm174_vm1, %v172_v41, %v173_v43  ;;  %s992_s24 = sshll.u32 %s1328_s23, 4  ;;  %s994_s27 = sshll.u32 %s1638_s6, 4  ;;  %s993_s24 = int_to_ptr.vmem [resolvable:$true] %s992_s24  ;;  %s995_s27 = int_to_ptr.hbm [resolvable:$true] %s994_s27 }
  0x1a   :  { %vm254_vm3 = vcmp.lt.s32.totalorder %v253_v47, %v1413_v45  ;;  %s1329_s28 = smov [#allocation12]   ;;  %s1005_s11 = sshll.u32 %s1639_s7, 4  ;;  %s1006_s11 = int_to_ptr.hbm [resolvable:$true] %s1005_s11 }
  0x1b   :  { %v1040_v50 = vsel %vm254_vm3, 1.0, %v1318_v49  ;;  %s1003_s29 = sshll.u32 %s1329_s28, 4  ;;  %s1330_s12 = smov [#allocation9]   ;;  %s1004_s29 = int_to_ptr.vmem [resolvable:$true] %s1003_s29 }
  0x1c   :  { %779 = vmatpush.bf16.msra.mxu1 %v1391_v7  ;;  %v112_v12 = vld.sshfl [vmem:[#allocation1] sm:$0xff pattern:$0x73625140]  ;;  %259 = vperm.xlu2 %1088, %v1040_v50   ;;  %s980_s6 = sshll.u32 %s1637_s5, 4  ;;  %s981_s6 = int_to_ptr.hbm [resolvable:$true] %s980_s6 }
  0x1d   :  { %1033 = vmatmul.msk.bf16.vlgmr.msra.gmra.mxu0 %vm126_vm0, %v112_v12 }
  0x20   :  { %v113_v13 = vld.sshfl [vmem:[#allocation1 + $0x20] sm:$0xff pattern:$0x73625140] }
  0x2d   :  { %1034 = vmatmul.msk.bf16.gmra.mxu0 %vm126_vm0, %v113_v13 }
  0x76   :  { %v260_v5 = vpop.permute.xlu2 %259 }
  0x94   :  { %v198_v14 = vpop.f32.mrf.mxu1 }
  0x95   :  { %v207_v29 = vrot.slane %v198_v14, 4 }
  0x9a   :  { %v140_v16 = vpop.f32.mrf.mxu0 }
  0x9b   :  { %v141_v17 = vadd.f32 %v1091_v15, %v140_v16 }
  0x9c   :  { %v200_v18 = vpop.f32.mrf.mxu1 }
  0x9d   :  { %v154_v19 = vrot.slane %v141_v17, 4  ;;  %162 = vst [vmem:[#allocation2] sm:$0xf] %v141_v17 }
  0x9f   :  { %163 = vst [vmem:[#allocation2 + $0x4] sm:$0xf] %v154_v19 }
  0xa2   :  { %v142_v20 = vpop.f32.mrf.mxu0 }
  0xa3   :  { %v143_v21 = vadd.f32 %v1091_v15, %v142_v20 }
  0xa4   :  { %v202_v33 = vld [vmem:[#allocation2] sm:$0xf] }
  0xa5   :  { %v155_v22 = vrot.slane %v143_v21, 4  ;;  %164 = vst [vmem:[#allocation2 + $0x8] sm:$0xf] %v143_v21  ;;  %v203_v34 = vadd.f32 %v202_v33, %v198_v14  ;;  %v1321_v21 = vmov 6  }
  0xa6   :  { %v299_v16 = vld [vmem:[#allocation2 + $0x4] sm:$0xf] }
  0xa7   :  { %165 = vst [vmem:[#allocation2 + $0xc] sm:$0xf] %v155_v22  ;;  %v350_v22 = vsel %vm178_vm2, 1, %v1321_v21 }
  0xa8   :  { %vm351_vm9 = vcmp.lt.s32.totalorder %v350_v22, %v1413_v45 }
  0xaa   :  { %v145_v23 = vpop.f32.mrf.mxu0 }
  0xab   :  { %v146_v24 = vadd.f32 %v1091_v15, %v145_v23 }
  0xad   :  { %v156_v25 = vrot.slane %v146_v24, 4  ;;  %166 = vst [vmem:[#allocation2 + $0x10] sm:$0xf] %v146_v24 }
  0xaf   :  { %167 = vst [vmem:[#allocation2 + $0x14] sm:$0xf] %v156_v25 }
  0xb2   :  { %v147_v26 = vpop.f32.mrf.mxu0 }
  0xb3   :  { %v148_v27 = vadd.f32 %v1091_v15, %v147_v26 }
  0xb5   :  { %v157_v28 = vrot.slane %v148_v27, 4  ;;  %168 = vst [vmem:[#allocation2 + $0x18] sm:$0xf] %v148_v27 }
  0xb7   :  { %169 = vst [vmem:[#allocation2 + $0x1c] sm:$0xf] %v157_v28 }
  0xbc   :  { %v302_v12 = vld [vmem:[#allocation2 + $0x18] sm:$0xf] }
  0xbe   :  { %v205_v30 = vld [vmem:[#allocation2 + $0x1c] sm:$0xf] }
  0xbf   :  { %v209_v31 = vadd.f32 %v207_v29, %v205_v30 }
  0xc1   :  { %v211_v32 = vrot.slane %v209_v31, 4 }
  0xc3   :  { %212 = vrot.lane.b32.xlu0 %v211_v32, %s1309_s9 }
 0x135   :  { %v213_v35 = vpop.permute.xlu0 %212 }
 0x136   :  { %v215_v36 = vsel %vm174_vm1, %v203_v34, %v213_v35 }
 0x137   :  { %1092 = vtanh.f32 %v215_v36  ;;  %v1039_v38 = vmul.f32 -1.442695, %v215_v36 }
 0x139   :  { %1094 = vpow2.f32 %v1039_v38 }
 0x13d   :  { %v1093_v37 = vpop.eup %1092 }
 0x13e   :  { %238 = vrot.lane.b32.xlu0 %v1093_v37, %s1316_s4 }
 0x13f   :  { %v1095_v39 = vpop.eup %1094 }
 0x140   :  { %v219_v40 = vadd.f32 1.0, %v1095_v39 }
 0x142   :  { %1096 = vrcp.f32 %v219_v40  ;;  %v231_v55 = vand.u32 2147483648, %v219_v40  ;;  %vm225_vm5 = vweird.f32 %v219_v40  ;;  %v229_v56 = vand.u32 2147483647, %v219_v40 }
 0x144   :  { %v232_v58 = vor.u32 1.1754944e-38, %v231_v55  ;;  %vm230_vm7 = vcmp.eq.f32.partialorder %v229_v56, 8.507059e+37  ;;  %v401_v56 = vld [vmem:[#allocation2 + $0x14] sm:$0xf] }
 0x148   :  { %v1097_v48 = vpop.eup %1096 }
 0x149   :  { %v221_v51 = vmul.f32 %v1097_v48, %v219_v40  ;;  %vm226_vm4 = vweird.f32 %v1097_v48 }
 0x14a   :  { %vm227_vm6 = vmor %vm225_vm5, %vm226_vm4 }
 0x14b   :  { %v222_v52 = vsub.f32 1.0, %v221_v51 }
 0x14d   :  { %v223_v53 = vmul.f32 %v1097_v48, %v222_v52 }
 0x14f   :  { %v224_v54 = vadd.f32 %v1097_v48, %v223_v53 }
 0x151   :  { %v228_v57 = vsel %vm227_vm6, %v1097_v48, %v224_v54 }
 0x152   :  { %v233_v60 = vsel %vm230_vm7, %v232_v58, %v228_v57 }
 0x153   :  { %v236_v62 = vmul.f32 0.0, %v233_v60 }
 0x1b0   :  { %v239_v59 = vpop.permute.xlu0 %238 }
 0x1b1   :  { %v241_v61 = vmul.f32 %v239_v59, %v233_v60 }
 0x1b3   :  { %243 = vrot.lane.b32.xlu1 %v241_v61, %s1319_s1 }
 0x225   :  { %v244_v63 = vpop.permute.xlu1 %243 }
 0x226   :  { %v246_v1 = vadd.f32 %v244_v63, %v236_v62 }
 0x228   :  { %1098 = vtanh.f32 %v246_v1  ;;  %v276_v38 = vmul.f32 %v260_v5, %v246_v1 }
 0x22e   :  { %v1099_v2 = vpop.eup %1098 }
 0x22f   :  { %249 = vrot.lane.b32.xlu1 %v1099_v2, %s1312_s2  ;;  %v1322_v2 = vmov 5  }
 0x2a1   :  { %v250_v3 = vpop.permute.xlu1 %249 }
 0x2a2   :  { %v252_v4 = vmul.f32 %v250_v3, %v233_v60  ;;  %v398_v60 = vld [vmem:[#allocation2 + $0x8] sm:$0xf]  ;;  %v449_v3 = vsel %vm178_vm2, 2, %v1322_v2 }
 0x2a3   :  { %vm450_vm14 = vcmp.lt.s32.totalorder %v449_v3, %v1413_v45 }
 0x2a4   :  { %v1422_v6 = vmul.f32 %v260_v5, %v252_v4  ;;  %v1046_v4 = vsel %vm450_vm14, 1.0, %v1318_v49 }
 0x2a6   :  { %v278_v8 = vpack.c.bf16 %v1422_v6, %v1422_v6 }
 0x2a8   :  { %280 = vrot.lane.b32.xlu2 %v278_v8, %s1320_s21 }
 0x302   :  { %v281_v9 = vpop.permute.xlu2 %280 }
 0x303   :  { %1041 = vmatmul.msk.bf16.vlgmr.msra.gmra.mxu2 %vm185_vm8, %v281_v9 }
 0x304   :  { %874 = vmatpush.bf16.msra.mxu2 %v1391_v7  ;;  %v1043_v7 = vsel %vm351_vm9, 1.0, %v1318_v49 }
 0x386   :  { %v294_v10 = vpop.f32.mrf.mxu2 }
 0x387   :  { %v304_v11 = vrot.slane %v294_v10, 4  ;;  %v300_v17 = vadd.f32 %v299_v16, %v294_v10 }
 0x389   :  { %v306_v13 = vadd.f32 %v304_v11, %v302_v12 }
 0x38b   :  { %v308_v14 = vrot.slane %v306_v13, 4 }
 0x38d   :  { %309 = vrot.lane.b32.xlu0 %v308_v14, %s1309_s9 }
 0x38e   :  { %v296_v15 = vpop.f32.mrf.mxu2 }
 0x3ff   :  { %v310_v18 = vpop.permute.xlu0 %309 }
 0x400   :  { %v312_v19 = vsel %vm174_vm1, %v300_v17, %v310_v18 }
 0x401   :  { %1100 = vtanh.f32 %v312_v19  ;;  %v1042_v23 = vmul.f32 -1.442695, %v312_v19 }
 0x403   :  { %1102 = vpow2.f32 %v1042_v23 }
 0x407   :  { %v1101_v20 = vpop.eup %1100 }
 0x408   :  { %335 = vrot.lane.b32.xlu1 %v1101_v20, %s1316_s4 }
 0x409   :  { %v1103_v24 = vpop.eup %1102 }
 0x40a   :  { %v316_v25 = vadd.f32 1.0, %v1103_v24 }
 0x40c   :  { %1104 = vrcp.f32 %v316_v25  ;;  %v328_v31 = vand.u32 2147483648, %v316_v25  ;;  %vm322_vm11 = vweird.f32 %v316_v25  ;;  %v326_v32 = vand.u32 2147483647, %v316_v25 }
 0x40e   :  { %v329_v34 = vor.u32 1.1754944e-38, %v328_v31  ;;  %vm327_vm13 = vcmp.eq.f32.partialorder %v326_v32, 8.507059e+37 }
 0x410   :  { %356 = vperm.xlu1 %1089, %v1043_v7  }
 0x412   :  { %v1105_v26 = vpop.eup %1104 }
 0x413   :  { %v318_v27 = vmul.f32 %v1105_v26, %v316_v25  ;;  %vm323_vm10 = vweird.f32 %v1105_v26 }
 0x414   :  { %vm324_vm12 = vmor %vm322_vm11, %vm323_vm10 }
 0x415   :  { %v319_v28 = vsub.f32 1.0, %v318_v27 }
 0x417   :  { %v320_v29 = vmul.f32 %v1105_v26, %v319_v28 }
 0x419   :  { %v321_v30 = vadd.f32 %v1105_v26, %v320_v29 }
 0x41b   :  { %v325_v33 = vsel %vm324_vm12, %v1105_v26, %v321_v30 }
 0x41c   :  { %v330_v36 = vsel %vm327_vm13, %v329_v34, %v325_v33 }
 0x41d   :  { %v333_v39 = vmul.f32 %v330_v36, %v276_v38 }
 0x47a   :  { %v336_v35 = vpop.permute.xlu1 %335 }
 0x47b   :  { %v338_v37 = vmul.f32 %v336_v35, %v330_v36 }
 0x47d   :  { %340 = vrot.lane.b32.xlu2 %v338_v37, %s1319_s1 }
 0x482   :  { %v1442_v48 = vpop.permute.xlu1 %356 }
 0x4d7   :  { %v341_v40 = vpop.permute.xlu2 %340 }
 0x4d8   :  { %v343_v41 = vadd.f32 %v341_v40, %v333_v39 }
 0x4da   :  { %1106 = vtanh.f32 %v343_v41  ;;  %v374_v22 = vsub.f32 %v343_v41, %v276_v38 }
 0x4dc   :  { %v375_v7 = vmul.f32 %v374_v22, %v1442_v48 }
 0x4de   :  { %v376_v23 = vadd.f32 %v375_v7, %v276_v38  ;;  %v500_v38 = vld [vmem:[#allocation2 + $0x10] sm:$0xf] }
 0x4e0   :  { %v1107_v42 = vpop.eup %1106 }
 0x4e1   :  { %346 = vrot.lane.b32.xlu0 %v1107_v42, %s1312_s2  ;;  %v497_v42 = vld [vmem:[#allocation2 + $0xc] sm:$0xf] }
 0x553   :  { %v347_v43 = vpop.permute.xlu0 %346 }
 0x554   :  { %v1438_v46 = vmul.f32 %v347_v43, %v330_v36 }
 0x556   :  { %v371_v47 = vsub.f32 %v1438_v46, %v1422_v6 }
 0x558   :  { %v372_v50 = vmul.f32 %v371_v47, %v1442_v48 }
 0x55a   :  { %v373_v51 = vadd.f32 %v372_v50, %v1422_v6 }
 0x55c   :  { %v377_v52 = vpack.c.bf16 %v373_v51, %v373_v51 }
 0x55e   :  { %379 = vrot.lane.b32.xlu2 %v377_v52, %s1320_s21  ;;  %v1323_v52 = vmov 4  }
 0x5b8   :  { %v380_v53 = vpop.permute.xlu2 %379 }
 0x5b9   :  { %1044 = vmatmul.msk.bf16.vlgmr.msra.gmra.mxu3 %vm185_vm8, %v380_v53  ;;  %v548_v53 = vsel %vm178_vm2, 3, %v1323_v52 }
 0x5ba   :  { %vm549_vm5 = vcmp.lt.s32.totalorder %v548_v53, %v1413_v45 }
 0x63c   :  { %v393_v54 = vpop.f32.mrf.mxu3 }
 0x63d   :  { %v403_v55 = vrot.slane %v393_v54, 4  ;;  %v399_v61 = vadd.f32 %v398_v60, %v393_v54  ;;  %v1049_v54 = vsel %vm549_vm5, 1.0, %v1318_v49 }
 0x63f   :  { %v405_v57 = vadd.f32 %v403_v55, %v401_v56 }
 0x641   :  { %v407_v58 = vrot.slane %v405_v57, 4 }
 0x643   :  { %408 = vrot.lane.b32.xlu0 %v407_v58, %s1309_s9 }
 0x644   :  { %v395_v59 = vpop.f32.mrf.mxu3 }
 0x6b5   :  { %v409_v62 = vpop.permute.xlu0 %408 }
 0x6b6   :  { %v411_v63 = vsel %vm174_vm1, %v399_v61, %v409_v62 }
 0x6b7   :  { %1108 = vtanh.f32 %v411_v63  ;;  %v1045_v5 = vmul.f32 -1.442695, %v411_v63 }
 0x6b9   :  { %1110 = vpow2.f32 %v1045_v5 }
 0x6bd   :  { %v1109_v1 = vpop.eup %1108 }
 0x6be   :  { %434 = vrot.lane.b32.xlu1 %v1109_v1, %s1316_s4 }
 0x6bf   :  { %v1111_v8 = vpop.eup %1110 }
 0x6c0   :  { %v415_v9 = vadd.f32 1.0, %v1111_v8 }
 0x6c2   :  { %1112 = vrcp.f32 %v415_v9  ;;  %v427_v15 = vand.u32 2147483648, %v415_v9  ;;  %vm421_vm0 = vweird.f32 %v415_v9  ;;  %v425_v16 = vand.u32 2147483647, %v415_v9 }
 0x6c4   :  { %v428_v18 = vor.u32 1.1754944e-38, %v427_v15  ;;  %vm426_vm4 = vcmp.eq.f32.partialorder %v425_v16, 8.507059e+37 }
 0x6c6   :  { %455 = vperm.xlu1 %1089, %v1046_v4  }
 0x6c8   :  { %v1113_v10 = vpop.eup %1112 }
 0x6c9   :  { %v417_v11 = vmul.f32 %v1113_v10, %v415_v9  ;;  %vm422_vm15 = vweird.f32 %v1113_v10 }
 0x6ca   :  { %vm423_vm3 = vmor %vm421_vm0, %vm422_vm15 }
 0x6cb   :  { %v418_v12 = vsub.f32 1.0, %v417_v11 }
 0x6cd   :  { %v419_v13 = vmul.f32 %v1113_v10, %v418_v12 }
 0x6cf   :  { %v420_v14 = vadd.f32 %v1113_v10, %v419_v13 }
 0x6d1   :  { %v424_v17 = vsel %vm423_vm3, %v1113_v10, %v420_v14 }
 0x6d2   :  { %v429_v20 = vsel %vm426_vm4, %v428_v18, %v424_v17 }
 0x6d3   :  { %v432_v24 = vmul.f32 %v429_v20, %v376_v23 }
 0x730   :  { %v435_v19 = vpop.permute.xlu1 %434 }
 0x731   :  { %v437_v21 = vmul.f32 %v435_v19, %v429_v20 }
 0x733   :  { %439 = vrot.lane.b32.xlu2 %v437_v21, %s1319_s1 }
 0x738   :  { %v1461_v31 = vpop.permute.xlu1 %455 }
 0x78d   :  { %v440_v25 = vpop.permute.xlu2 %439 }
 0x78e   :  { %v442_v26 = vadd.f32 %v440_v25, %v432_v24  ;;  %v597_v25 = vld [vmem:[#allocation2 + $0xc] sm:$0xf] }
 0x790   :  { %1114 = vtanh.f32 %v442_v26  ;;  %v473_v9 = vsub.f32 %v442_v26, %v376_v23 }
 0x792   :  { %v474_v10 = vmul.f32 %v473_v9, %v1461_v31 }
 0x794   :  { %v475_v11 = vadd.f32 %v474_v10, %v376_v23 }
 0x796   :  { %v1115_v27 = vpop.eup %1114 }
 0x797   :  { %445 = vrot.lane.b32.xlu0 %v1115_v27, %s1312_s2 }
 0x809   :  { %v446_v28 = vpop.permute.xlu0 %445 }
 0x80a   :  { %v1458_v29 = vmul.f32 %v446_v28, %v429_v20 }
 0x80c   :  { %v470_v30 = vsub.f32 %v1458_v29, %v373_v51 }
 0x80e   :  { %v471_v32 = vmul.f32 %v470_v30, %v1461_v31  ;;  %v595_v30 = vld [vmem:[#allocation2 + $0x10] sm:$0xf] }
 0x810   :  { %v472_v33 = vadd.f32 %v471_v32, %v373_v51 }
 0x812   :  { %v476_v34 = vpack.c.bf16 %v472_v33, %v472_v33 }
 0x814   :  { %478 = vrot.lane.b32.xlu2 %v476_v34, %s1320_s21 }
 0x86e   :  { %v479_v35 = vpop.permute.xlu2 %478 }
 0x86f   :  { %1047 = vmatmul.msk.bf16.vlgmr.msrb.gmra.mxu1 %vm185_vm8, %v479_v35 }
 0x8ec   :  { %v492_v36 = vpop.f32.mrf.mxu1 }
 0x8ed   :  { %v502_v37 = vrot.slane %v492_v36, 4  ;;  %v498_v43 = vadd.f32 %v497_v42, %v492_v36  ;;  %v1324_v36 = vmov 3  }
 0x8ef   :  { %v504_v39 = vadd.f32 %v502_v37, %v500_v38  ;;  %v645_v37 = vsel %vm178_vm2, 4, %v1324_v36 }
 0x8f0   :  { %vm646_vm11 = vcmp.lt.s32.totalorder %v645_v37, %v1413_v45 }
 0x8f1   :  { %v506_v40 = vrot.slane %v504_v39, 4  ;;  %v1052_v38 = vsel %vm646_vm11, 1.0, %v1318_v49 }
 0x8f3   :  { %507 = vrot.lane.b32.xlu0 %v506_v40, %s1309_s9 }
 0x8f4   :  { %v494_v41 = vpop.f32.mrf.mxu1 }
 0x965   :  { %v508_v47 = vpop.permute.xlu0 %507 }
 0x966   :  { %v510_v50 = vsel %vm174_vm1, %v498_v43, %v508_v47 }
 0x967   :  { %1116 = vtanh.f32 %v510_v50  ;;  %v1048_v55 = vmul.f32 -1.442695, %v510_v50 }
 0x969   :  { %1118 = vpow2.f32 %v1048_v55 }
 0x96d   :  { %v1117_v51 = vpop.eup %1116 }
 0x96e   :  { %533 = vrot.lane.b32.xlu1 %v1117_v51, %s1316_s4 }
 0x96f   :  { %v1119_v56 = vpop.eup %1118 }
 0x970   :  { %v514_v57 = vadd.f32 1.0, %v1119_v56 }
 0x972   :  { %1120 = vrcp.f32 %v514_v57  ;;  %v526_v63 = vand.u32 2147483648, %v514_v57  ;;  %vm520_vm7 = vweird.f32 %v514_v57  ;;  %v524_v1 = vand.u32 2147483647, %v514_v57 }
 0x974   :  { %v527_v3 = vor.u32 1.1754944e-38, %v526_v63  ;;  %vm525_vm10 = vcmp.eq.f32.partialorder %v524_v1, 8.507059e+37 }
 0x976   :  { %554 = vperm.xlu1 %1089, %v1049_v54  }
 0x978   :  { %v1121_v58 = vpop.eup %1120 }
 0x979   :  { %v516_v59 = vmul.f32 %v1121_v58, %v514_v57  ;;  %vm521_vm6 = vweird.f32 %v1121_v58 }
 0x97a   :  { %vm522_vm9 = vmor %vm520_vm7, %vm521_vm6 }
 0x97b   :  { %v517_v60 = vsub.f32 1.0, %v516_v59 }
 0x97d   :  { %v518_v61 = vmul.f32 %v1121_v58, %v517_v60 }
 0x97f   :  { %v519_v62 = vadd.f32 %v1121_v58, %v518_v61 }
 0x981   :  { %v523_v2 = vsel %vm522_vm9, %v1121_v58, %v519_v62 }
 0x982   :  { %v528_v5 = vsel %vm525_vm10, %v527_v3, %v523_v2 }
 0x983   :  { %v531_v12 = vmul.f32 %v528_v5, %v475_v11 }
 0x9e0   :  { %v534_v4 = vpop.permute.xlu1 %533 }
 0x9e1   :  { %v536_v8 = vmul.f32 %v534_v4, %v528_v5 }
 0x9e3   :  { %538 = vrot.lane.b32.xlu2 %v536_v8, %s1319_s1 }
 0x9e8   :  { %v1479_v19 = vpop.permute.xlu1 %554 }
 0xa3d   :  { %v539_v13 = vpop.permute.xlu2 %538 }
 0xa3e   :  { %v541_v14 = vadd.f32 %v539_v13, %v531_v12 }
 0xa40   :  { %1122 = vtanh.f32 %v541_v14  ;;  %v572_v59 = vsub.f32 %v541_v14, %v475_v11 }
 0xa42   :  { %v573_v60 = vmul.f32 %v572_v59, %v1479_v19 }
 0xa44   :  { %v574_v61 = vadd.f32 %v573_v60, %v475_v11 }
 0xa46   :  { %v1123_v15 = vpop.eup %1122 }
 0xa47   :  { %544 = vrot.lane.b32.xlu0 %v1123_v15, %s1312_s2  ;;  %v692_v15 = vld [vmem:[#allocation2 + $0x8] sm:$0xf] }
 0xab9   :  { %v545_v16 = vpop.permute.xlu0 %544 }
 0xaba   :  { %v1476_v17 = vmul.f32 %v545_v16, %v528_v5 }
 0xabc   :  { %v569_v18 = vsub.f32 %v1476_v17, %v472_v33 }
 0xabe   :  { %v570_v20 = vmul.f32 %v569_v18, %v1479_v19 }
 0xac0   :  { %v571_v21 = vadd.f32 %v570_v20, %v472_v33 }
 0xac2   :  { %v575_v22 = vpack.c.bf16 %v571_v21, %v571_v21 }
 0xac4   :  { %577 = vrot.lane.b32.xlu2 %v575_v22, %s1320_s21  ;;  %v690_v22 = vld [vmem:[#allocation2 + $0x14] sm:$0xf] }
 0xb1e   :  { %v578_v7 = vpop.permute.xlu2 %577 }
 0xb1f   :  { %1050 = vmatmul.msk.bf16.vlgmr.msrb.gmra.mxu2 %vm185_vm8, %v578_v7 }
 0xba2   :  { %v591_v23 = vpop.f32.mrf.mxu2 }
 0xba3   :  { %v599_v24 = vrot.slane %v591_v23, 4  ;;  %v596_v32 = vadd.f32 %v595_v30, %v591_v23 }
 0xba5   :  { %v601_v26 = vadd.f32 %v599_v24, %v597_v25  ;;  %v1325_v25 = vmov 2  }
 0xba7   :  { %v603_v27 = vrot.slane %v601_v26, 4  ;;  %v740_v26 = vsel %vm178_vm2, 5, %v1325_v25 }
 0xba8   :  { %vm741_vm0 = vcmp.lt.s32.totalorder %v740_v26, %v1413_v45 }
 0xba9   :  { %604 = vrot.lane.b32.xlu0 %v603_v27, %s1309_s9  ;;  %v1055_v27 = vsel %vm741_vm0, 1.0, %v1318_v49  ;;  %vm267_vm0 = vcmask 125952  }
 0xbaa   :  { %v593_v28 = vpop.f32.mrf.mxu2 }
 0xc1b   :  { %v605_v34 = vpop.permute.xlu0 %604 }
 0xc1c   :  { %v607_v35 = vsel %vm174_vm1, %v596_v32, %v605_v34 }
 0xc1d   :  { %1124 = vtanh.f32 %v607_v35  ;;  %v1051_v39 = vmul.f32 -1.442695, %v607_v35 }
 0xc1f   :  { %1126 = vpow2.f32 %v1051_v39 }
 0xc23   :  { %v1125_v33 = vpop.eup %1124 }
 0xc24   :  { %630 = vrot.lane.b32.xlu1 %v1125_v33, %s1316_s4 }
 0xc25   :  { %v1127_v40 = vpop.eup %1126 }
 0xc26   :  { %v611_v41 = vadd.f32 1.0, %v1127_v40 }
 0xc28   :  { %1128 = vrcp.f32 %v611_v41  ;;  %v623_v52 = vand.u32 2147483648, %v611_v41  ;;  %vm617_vm13 = vweird.f32 %v611_v41  ;;  %v621_v53 = vand.u32 2147483647, %v611_v41 }
 0xc2a   :  { %v624_v55 = vor.u32 1.1754944e-38, %v623_v52  ;;  %vm622_vm15 = vcmp.eq.f32.partialorder %v621_v53, 8.507059e+37 }
 0xc2c   :  { %651 = vperm.xlu1 %1089, %v1052_v38  }
 0xc2e   :  { %v1129_v42 = vpop.eup %1128 }
 0xc2f   :  { %v613_v43 = vmul.f32 %v1129_v42, %v611_v41  ;;  %vm618_vm12 = vweird.f32 %v1129_v42 }
 0xc30   :  { %vm619_vm14 = vmor %vm617_vm13, %vm618_vm12 }
 0xc31   :  { %v614_v47 = vsub.f32 1.0, %v613_v43 }
 0xc33   :  { %v615_v50 = vmul.f32 %v1129_v42, %v614_v47 }
 0xc35   :  { %v616_v51 = vadd.f32 %v1129_v42, %v615_v50 }
 0xc37   :  { %v620_v54 = vsel %vm619_vm14, %v1129_v42, %v616_v51 }
 0xc38   :  { %v625_v57 = vsel %vm622_vm15, %v624_v55, %v620_v54 }
 0xc39   :  { %v628_v62 = vmul.f32 %v625_v57, %v574_v61 }
 0xc96   :  { %v631_v56 = vpop.permute.xlu1 %630 }
 0xc97   :  { %v633_v58 = vmul.f32 %v631_v56, %v625_v57 }
 0xc99   :  { %635 = vrot.lane.b32.xlu2 %v633_v58, %s1319_s1 }
 0xc9e   :  { %v1497_v8 = vpop.permute.xlu1 %651 }
 0xcf3   :  { %v636_v63 = vpop.permute.xlu2 %635 }
 0xcf4   :  { %v638_v1 = vadd.f32 %v636_v63, %v628_v62 }
 0xcf6   :  { %1130 = vtanh.f32 %v638_v1  ;;  %v667_v50 = vsub.f32 %v638_v1, %v574_v61 }
 0xcf8   :  { %v668_v51 = vmul.f32 %v667_v50, %v1497_v8 }
 0xcfa   :  { %v669_v52 = vadd.f32 %v668_v51, %v574_v61 }
 0xcfc   :  { %v1131_v2 = vpop.eup %1130 }
 0xcfd   :  { %641 = vrot.lane.b32.xlu0 %v1131_v2, %s1312_s2 }
 0xd6f   :  { %v642_v3 = vpop.permute.xlu0 %641 }
 0xd70   :  { %v1494_v4 = vmul.f32 %v642_v3, %v625_v57 }
 0xd72   :  { %v664_v5 = vsub.f32 %v1494_v4, %v571_v21 }
 0xd74   :  { %v665_v9 = vmul.f32 %v664_v5, %v1497_v8  ;;  %v787_v5 = vld [vmem:[#allocation2 + $0x4] sm:$0xf] }
 0xd76   :  { %v666_v10 = vadd.f32 %v665_v9, %v571_v21 }
 0xd78   :  { %v670_v12 = vpack.c.bf16 %v666_v10, %v666_v10 }
 0xd7a   :  { %672 = vrot.lane.b32.xlu2 %v670_v12, %s1320_s21 }
 0xdd4   :  { %v673_v11 = vpop.permute.xlu2 %672 }
 0xdd5   :  { %1053 = vmatmul.msk.bf16.vlgmr.msrb.gmra.mxu3 %vm185_vm8, %v673_v11 }
 0xe58   :  { %v686_v13 = vpop.f32.mrf.mxu3 }
 0xe59   :  { %v694_v14 = vrot.slane %v686_v13, 4  ;;  %v691_v7 = vadd.f32 %v690_v22, %v686_v13  ;;  %v785_v13 = vld [vmem:[#allocation2 + $0x18] sm:$0xf] }
 0xe5b   :  { %v696_v16 = vadd.f32 %v694_v14, %v692_v15 }
 0xe5d   :  { %v698_v18 = vrot.slane %v696_v16, 4 }
 0xe5f   :  { %699 = vrot.lane.b32.xlu0 %v698_v18, %s1309_s9  ;;  %v1326_v18 = vmov 1  }
 0xe60   :  { %v688_v20 = vpop.f32.mrf.mxu3 }
 0xe61   :  { %v835_v20 = vsel %vm178_vm2, 6, %v1326_v18 }
 0xe62   :  { %vm836_vm7 = vcmp.lt.s32.totalorder %v835_v20, %v1413_v45 }
 0xe63   :  { %v1058_v22 = vsel %vm836_vm7, 1.0, %v1318_v49 }
 0xed1   :  { %v700_v23 = vpop.permute.xlu0 %699 }
 0xed2   :  { %v702_v24 = vsel %vm174_vm1, %v691_v7, %v700_v23 }
 0xed3   :  { %1132 = vtanh.f32 %v702_v24  ;;  %v1054_v28 = vmul.f32 -1.442695, %v702_v24 }
 0xed5   :  { %1134 = vpow2.f32 %v1054_v28 }
 0xed9   :  { %v1133_v21 = vpop.eup %1132 }
 0xeda   :  { %725 = vrot.lane.b32.xlu1 %v1133_v21, %s1316_s4 }
 0xedb   :  { %v1135_v30 = vpop.eup %1134 }
 0xedc   :  { %v706_v32 = vadd.f32 1.0, %v1135_v30 }
 0xede   :  { %1136 = vrcp.f32 %v706_v32  ;;  %v718_v38 = vand.u32 2147483648, %v706_v32  ;;  %vm712_vm4 = vweird.f32 %v706_v32  ;;  %v716_v39 = vand.u32 2147483647, %v706_v32 }
 0xee0   :  { %v719_v41 = vor.u32 1.1754944e-38, %v718_v38  ;;  %vm717_vm6 = vcmp.eq.f32.partialorder %v716_v39, 8.507059e+37 }
 0xee2   :  { %746 = vperm.xlu1 %1089, %v1055_v27  }
 0xee4   :  { %v1137_v34 = vpop.eup %1136 }
 0xee5   :  { %v708_v35 = vmul.f32 %v1137_v34, %v706_v32  ;;  %vm713_vm3 = vweird.f32 %v1137_v34 }
 0xee6   :  { %vm714_vm5 = vmor %vm712_vm4, %vm713_vm3  ;;  %vm273_vm3 = vcmask 261252   ;;  %vm964_vm4 = vcmask 257024  }
 0xee7   :  { %v709_v33 = vsub.f32 1.0, %v708_v35 }
 0xee9   :  { %v710_v36 = vmul.f32 %v1137_v34, %v709_v33 }
 0xeeb   :  { %v711_v37 = vadd.f32 %v1137_v34, %v710_v36 }
 0xeed   :  { %v715_v40 = vsel %vm714_vm5, %v1137_v34, %v711_v37 }
 0xeee   :  { %v720_v43 = vsel %vm717_vm6, %v719_v41, %v715_v40 }
 0xeef   :  { %v723_v53 = vmul.f32 %v720_v43, %v669_v52 }
 0xf4c   :  { %v726_v42 = vpop.permute.xlu1 %725 }
 0xf4d   :  { %v728_v47 = vmul.f32 %v726_v42, %v720_v43 }
 0xf4f   :  { %730 = vrot.lane.b32.xlu2 %v728_v47, %s1319_s1 }
 0xf54   :  { %v1515_v60 = vpop.permute.xlu1 %746 }
 0xfa9   :  { %v731_v54 = vpop.permute.xlu2 %730 }
 0xfaa   :  { %v733_v55 = vadd.f32 %v731_v54, %v723_v53 }
 0xfac   :  { %1138 = vtanh.f32 %v733_v55  ;;  %v762_v38 = vsub.f32 %v733_v55, %v669_v52 }
 0xfae   :  { %v763_v39 = vmul.f32 %v762_v38, %v1515_v60 }
 0xfb0   :  { %v1529_v40 = vadd.f32 %v763_v39, %v669_v52 }
 0xfb2   :  { %v1139_v56 = vpop.eup %1138 }
 0xfb3   :  { %736 = vrot.lane.b32.xlu0 %v1139_v56, %s1312_s2 }
0x1025   :  { %v737_v57 = vpop.permute.xlu0 %736 }
0x1026   :  { %v1512_v58 = vmul.f32 %v737_v57, %v720_v43 }
0x1028   :  { %v759_v59 = vsub.f32 %v1512_v58, %v666_v10  ;;  %v1567_v44 = vmul.f32 %v1515_v60, %v1512_v58 }
0x102a   :  { %v760_v62 = vmul.f32 %v759_v59, %v1515_v60 }
0x102c   :  { %v761_v63 = vadd.f32 %v760_v62, %v666_v10 }
0x102e   :  { %v765_v1 = vpack.c.bf16 %v761_v63, %v761_v63 }
0x1030   :  { %767 = vrot.lane.b32.xlu2 %v765_v1, %s1320_s21  ;;  %v882_v1 = vld [vmem:[#allocation2] sm:$0xf] }
0x108a   :  { %v768_v61 = vpop.permute.xlu2 %767 }
0x108b   :  { %1056 = vmatmul.msk.bf16.vlgmr.msra.gmra.mxu1 %vm185_vm8, %v768_v61 }
0x1108   :  { %v781_v2 = vpop.f32.mrf.mxu1 }
0x1109   :  { %v789_v3 = vrot.slane %v781_v2, 4  ;;  %v786_v14 = vadd.f32 %v785_v13, %v781_v2  ;;  %v930_v13 = vsel %vm178_vm2, 7, %v1315_v0  ;;  %v654_v0 = vmul.f32 %v1497_v8, %v1494_v4 }
0x110a   :  { %vm931_vm13 = vcmp.lt.s32.totalorder %v930_v13, %v1413_v45 }
0x110b   :  { %v791_v9 = vadd.f32 %v789_v3, %v787_v5  ;;  %v880_v5 = vld [vmem:[#allocation2 + $0x1c] sm:$0xf] }
0x110d   :  { %v793_v12 = vrot.slane %v791_v9, 4 }
0x110f   :  { %794 = vrot.lane.b32.xlu0 %v793_v12, %s1309_s9 }
0x1110   :  { %v783_v11 = vpop.f32.mrf.mxu1 }
0x1181   :  { %v795_v15 = vpop.permute.xlu0 %794 }
0x1182   :  { %v797_v16 = vsel %vm174_vm1, %v786_v14, %v795_v15  ;;  %v1061_v14 = vsel %vm931_vm13, 1.0, %v1318_v49  ;;  %v359_v15 = vmul.f32 %v1442_v48, %v1438_v46 }
0x1183   :  { %1140 = vtanh.f32 %v797_v16  ;;  %v1057_v7 = vmul.f32 -1.442695, %v797_v16  ;;  %v557_v16 = vmul.f32 %v1479_v19, %v1476_v17 }
0x1185   :  { %1142 = vpow2.f32 %v1057_v7 }
0x1189   :  { %v1141_v10 = vpop.eup %1140 }
0x118a   :  { %820 = vrot.lane.b32.xlu1 %v1141_v10, %s1316_s4 }
0x118b   :  { %v1143_v23 = vpop.eup %1142 }
0x118c   :  { %v801_v24 = vadd.f32 1.0, %v1143_v23 }
0x118e   :  { %1144 = vrcp.f32 %v801_v24  ;;  %v813_v30 = vand.u32 2147483648, %v801_v24  ;;  %vm807_vm10 = vweird.f32 %v801_v24  ;;  %v811_v32 = vand.u32 2147483647, %v801_v24 }
0x1190   :  { %v814_v35 = vor.u32 1.1754944e-38, %v813_v30  ;;  %vm812_vm12 = vcmp.eq.f32.partialorder %v811_v32, 8.507059e+37 }
0x1192   :  { %841 = vperm.xlu1 %1089, %v1058_v22  }
0x1194   :  { %v1145_v21 = vpop.eup %1144 }
0x1195   :  { %v803_v25 = vmul.f32 %v1145_v21, %v801_v24  ;;  %vm808_vm9 = vweird.f32 %v1145_v21 }
0x1196   :  { %vm809_vm11 = vmor %vm807_vm10, %vm808_vm9 }
0x1197   :  { %v804_v26 = vsub.f32 1.0, %v803_v25 }
0x1199   :  { %v805_v27 = vmul.f32 %v1145_v21, %v804_v26 }
0x119b   :  { %v806_v28 = vadd.f32 %v1145_v21, %v805_v27 }
0x119d   :  { %v810_v34 = vsel %vm809_vm11, %v1145_v21, %v806_v28 }
0x119e   :  { %v815_v36 = vsel %vm812_vm12, %v814_v35, %v810_v34 }
0x119f   :  { %v818_v41 = vmul.f32 %v815_v36, %v1529_v40 }
0x11fc   :  { %v821_v33 = vpop.permute.xlu1 %820 }
0x11fd   :  { %v823_v37 = vmul.f32 %v821_v33, %v815_v36 }
0x11ff   :  { %825 = vrot.lane.b32.xlu2 %v823_v37, %s1319_s1  ;;  %v458_v37 = vmul.f32 %v1461_v31, %v1458_v29 }
0x1204   :  { %v1539_v54 = vpop.permute.xlu1 %841 }
0x1259   :  { %v826_v42 = vpop.permute.xlu2 %825 }
0x125a   :  { %v1532_v43 = vadd.f32 %v826_v42, %v818_v41 }
0x125c   :  { %1146 = vtanh.f32 %v1532_v43  ;;  %v857_v26 = vsub.f32 %v1532_v43, %v1529_v40 }
0x125e   :  { %v858_v27 = vmul.f32 %v857_v26, %v1539_v54 }
0x1260   :  { %v859_v28 = vadd.f32 %v858_v27, %v1529_v40 }
0x1262   :  { %v1147_v47 = vpop.eup %1146 }
0x1263   :  { %831 = vrot.lane.b32.xlu0 %v1147_v47, %s1312_s2 }
0x12d5   :  { %v832_v50 = vpop.permute.xlu0 %831 }
0x12d6   :  { %v1536_v51 = vmul.f32 %v832_v50, %v815_v36 }
0x12d8   :  { %v854_v53 = vsub.f32 %v1536_v51, %v761_v63  ;;  %v844_v25 = vmul.f32 %v1539_v54, %v1536_v51 }
0x12da   :  { %v855_v52 = vmul.f32 %v854_v53, %v1539_v54 }
0x12dc   :  { %v1542_v55 = vadd.f32 %v855_v52, %v761_v63 }
0x12de   :  { %v860_v56 = vpack.c.bf16 %v1542_v55, %v1542_v55 }
0x12e0   :  { %862 = vrot.lane.b32.xlu2 %v860_v56, %s1320_s21 }
0x133a   :  { %v863_v57 = vpop.permute.xlu2 %862 }
0x133b   :  { %1059 = vmatmul.msk.bf16.vlgmr.msra.gmra.mxu2 %vm185_vm8, %v863_v57 }
0x13be   :  { %v876_v59 = vpop.f32.mrf.mxu2 }
0x13bf   :  { %v884_v62 = vrot.slane %v876_v59, 4  ;;  %v881_v9 = vadd.f32 %v880_v5, %v876_v59 }
0x13c1   :  { %v886_v61 = vadd.f32 %v884_v62, %v882_v1 }
0x13c3   :  { %v888_v2 = vrot.slane %v886_v61, 4 }
0x13c5   :  { %889 = vrot.lane.b32.xlu0 %v888_v2, %s1309_s9 }
0x13c6   :  { %v878_v3 = vpop.f32.mrf.mxu2 }
0x1437   :  { %v890_v63 = vpop.permute.xlu0 %889 }
0x1438   :  { %v892_v12 = vsel %vm174_vm1, %v881_v9, %v890_v63 }
0x1439   :  { %1148 = vtanh.f32 %v892_v12  ;;  %v1060_v45 = vmul.f32 -1.442695, %v892_v12 }
0x143b   :  { %1150 = vpow2.f32 %v1060_v45 }
0x143f   :  { %v1149_v11 = vpop.eup %1148 }
0x1440   :  { %915 = vrot.lane.b32.xlu1 %v1149_v11, %s1316_s4 }
0x1441   :  { %v1151_v49 = vpop.eup %1150 }
0x1442   :  { %v896_v46 = vadd.f32 1.0, %v1151_v49 }
0x1444   :  { %1152 = vrcp.f32 %v896_v46  ;;  %v908_v4 = vand.u32 2147483648, %v896_v46  ;;  %vm902_vm2 = vweird.f32 %v896_v46  ;;  %v906_v8 = vand.u32 2147483647, %v896_v46 }
0x1446   :  { %v909_v60 = vor.u32 1.1754944e-38, %v908_v4  ;;  %vm907_vm15 = vcmp.eq.f32.partialorder %v906_v8, 8.507059e+37 }
0x1448   :  { %936 = vperm.xlu1 %1089, %v1061_v14  }
0x144a   :  { %v1153_v48 = vpop.eup %1152 }
0x144b   :  { %v898_v17 = vmul.f32 %v1153_v48, %v896_v46  ;;  %vm903_vm1 = vweird.f32 %v1153_v48 }
0x144c   :  { %vm904_vm14 = vmor %vm902_vm2, %vm903_vm1 }
0x144d   :  { %v899_v19 = vsub.f32 1.0, %v898_v17 }
0x144f   :  { %v900_v10 = vmul.f32 %v1153_v48, %v899_v19 }
0x1450   :  { %361 = vrot.lane.b32.xlu1 %v359_v15, %s1320_s21 }
0x1451   :  { %v901_v18 = vadd.f32 %v1153_v48, %v900_v10 }
0x1453   :  { %v905_v58 = vsel %vm904_vm14, %v1153_v48, %v901_v18 }
0x1454   :  { %v910_v22 = vsel %vm907_vm15, %v909_v60, %v905_v58 }
0x1455   :  { %v913_v30 = vmul.f32 %v910_v22, %v859_v28 }
0x1458   :  { %559 = vrot.lane.b32.xlu1 %v557_v16, %s1320_s21 }
0x1460   :  { %656 = vrot.lane.b32.xlu1 %v654_v0, %s1320_s21 }
0x1468   :  { %755 = vrot.lane.b32.xlu1 %v1567_v44, %s1316_s4 }
0x14b2   :  { %v916_v20 = vpop.permute.xlu1 %915 }
0x14b3   :  { %v918_v7 = vmul.f32 %v916_v20, %v910_v22 }
0x14b5   :  { %920 = vrot.lane.b32.xlu2 %v918_v7, %s1319_s1 }
0x14ba   :  { %v937_v23 = vpop.permute.xlu1 %936 }
0x14bd   :  { %264 = vrot.lane.b32.xlu2 %v1422_v6, %s1320_s21 }
0x14c2   :  { %v362_v24 = vpop.permute.xlu1 %361 }
0x14c3   :  { %365 = vst.msk [vmem:[#allocation9 + $0x4] sm:$0xf] %vm267_vm0, %v362_v24 }
0x14c5   :  { %366 = vrot.lane.b32.xlu2 %v359_v15, %s1316_s4 }
0x14ca   :  { %v560_v21 = vpop.permute.xlu1 %559 }
0x14cb   :  { %563 = vst.msk [vmem:[#allocation9 + $0xc] sm:$0xf] %vm267_vm0, %v560_v21 }
0x14cd   :  { %564 = vrot.lane.b32.xlu2 %v557_v16, %s1316_s4 }
0x14d2   :  { %v657_v39 = vpop.permute.xlu1 %656 }
0x14d5   :  { %660 = vrot.lane.b32.xlu2 %v654_v0, %s1316_s4 }
0x14da   :  { %v756_v57 = vpop.permute.xlu1 %755 }
0x14dd   :  { %846 = vrot.lane.b32.xlu2 %v844_v25, %s1320_s21 }
0x150f   :  { %v921_v32 = vpop.permute.xlu2 %920 }
0x1510   :  { %v923_v34 = vadd.f32 %v921_v32, %v913_v30 }
0x1512   :  { %1154 = vtanh.f32 %v923_v34  ;;  %v952_v40 = vsub.f32 %v923_v34, %v859_v28 }
0x1514   :  { %v953_v42 = vmul.f32 %v952_v40, %v937_v23 }
0x1517   :  { %v265_v35 = vpop.permute.xlu2 %264 }
0x1518   :  { %v1155_v33 = vpop.eup %1154  ;;  %268 = vst.msk [vmem:[#allocation9] sm:$0xf] %vm267_vm0, %v265_v35 }
0x1519   :  { %926 = vrot.lane.b32.xlu0 %v1155_v33, %s1312_s2  ;;  %s978_s2 = sshll.u32 %s1330_s12, 4  ;;  %s979_s2 = int_to_ptr.vmem [resolvable:$true] %s978_s2 }
0x151f   :  { %v367_v36 = vpop.permute.xlu2 %366 }
0x1520   :  { %370 = vst.msk [vmem:[#allocation9 + $0x14] sm:$0xf0] %vm273_vm3, %v367_v36 }
0x1521   :  { %269 = vrot.lane.b32.xlu0 %v1422_v6, %s1316_s4  ;;  %v954_v6 = vadd.f32 %v953_v42, %v859_v28 }
0x1523   :  { %v970_v59 = vrot.slane %v954_v6, 4 }
0x1527   :  { %v565_v38 = vpop.permute.xlu2 %564 }
0x1528   :  { %568 = vst.msk [vmem:[#allocation9 + $0xc] sm:$0xf0] %vm273_vm3, %v565_v38 }
0x1529   :  { %659 = vst.msk [vmem:[#allocation9 + $0x10] sm:$0xf] %vm267_vm0, %v657_v39  ;;  %460 = vrot.lane.b32.xlu0 %v458_v37, %s1320_s21 }
0x152f   :  { %v661_v41 = vpop.permute.xlu2 %660 }
0x1530   :  { %663 = vst.msk [vmem:[#allocation9 + $0x8] sm:$0xf0] %vm273_vm3, %v661_v41 }
0x1531   :  { %465 = vrot.lane.b32.xlu0 %v458_v37, %s1316_s4 }
0x1537   :  { %v847_v43 = vpop.permute.xlu2 %846 }
0x1538   :  { %849 = vst.msk [vmem:[#allocation9 + $0x18] sm:$0xf] %vm267_vm0, %v847_v43 }
0x1539   :  { %967 = vrot.lane.b32.xlu0 %v954_v6, %s1327_s22 }
0x1541   :  { %751 = vrot.lane.b32.xlu0 %v1567_v44, %s1320_s21 }
0x1549   :  { %850 = vrot.lane.b32.xlu0 %v844_v25, %s1316_s4 }
0x158b   :  { %v927_v29 = vpop.permute.xlu0 %926 }
0x158c   :  { %v929_v31 = vmul.f32 %v927_v29, %v910_v22 }
0x158e   :  { %v949_v47 = vsub.f32 %v929_v31, %v1542_v55  ;;  %v939_v52 = vmul.f32 %v937_v23, %v929_v31 }
0x1590   :  { %v950_v50 = vmul.f32 %v949_v47, %v937_v23 }
0x1592   :  { %v951_v51 = vadd.f32 %v950_v50, %v1542_v55 }
0x1593   :  { %v270_v53 = vpop.permute.xlu0 %269 }
0x1594   :  { %274 = vst.msk [vmem:[#allocation9 + $0x18] sm:$0xf0] %vm273_vm3, %v270_v53  ;;  %956 = vrot.lane.b32.xlu1 %v951_v51, %s1320_s21  ;;  %v959_v54 = vrot.slane %v951_v51, 4 }
0x1596   :  { %960 = vrot.lane.b32.xlu2 %v959_v54, %s1316_s4 }
0x159b   :  { %v461_v56 = vpop.permute.xlu0 %460 }
0x159c   :  { %464 = vst.msk [vmem:[#allocation9 + $0x8] sm:$0xf] %vm267_vm0, %v461_v56  ;;  %941 = vrot.lane.b32.xlu1 %v939_v52, %s1320_s21 }
0x159d   :  { %758 = vst.msk [vmem:[#allocation9 + $0x4] sm:$0xf0] %vm273_vm3, %v756_v57 }
0x159e   :  { %945 = vrot.lane.b32.xlu2 %v939_v52, %s1316_s4 }
0x15a3   :  { %v466_v55 = vpop.permute.xlu0 %465 }
0x15a4   :  { %469 = vst.msk [vmem:[#allocation9 + $0x10] sm:$0xf0] %vm273_vm3, %v466_v55 }
0x15ab   :  { %v968_v62 = vpop.permute.xlu0 %967 }
0x15ac   :  { %v972_v1 = vsel %vm185_vm8, %v968_v62, %v970_v59 }
0x15ad   :  { %973 = vst.msk [vmem:[#allocation12] sm:$0xf] %vm964_vm4, %v972_v1 }
0x15b3   :  { %v752_v61 = vpop.permute.xlu0 %751 }
0x15b4   :  { %754 = vst.msk [vmem:[#allocation9 + $0x14] sm:$0xf] %vm267_vm0, %v752_v61 }
0x15bb   :  { %v851_v2 = vpop.permute.xlu0 %850 }
0x15bc   :  { %853 = vst.msk [vmem:[#allocation9] sm:$0xf0] %vm273_vm3, %v851_v2 }
0x15f0   :  { %v961_v3 = vpop.permute.xlu2 %960 }
0x15f8   :  { %v946_v5 = vpop.permute.xlu2 %945 }
0x15f9   :  { %948 = vst.msk [vmem:[#allocation9 - $0x4] sm:$0xf0] %vm273_vm3, %v946_v5 }
0x1606   :  { %v957_v9 = vpop.permute.xlu1 %956 }
0x1607   :  { %v963_v63 = vsel %vm185_vm8, %v957_v9, %v961_v3 }
0x1608   :  { %965 = vst.msk [vmem:[#allocation10] sm:$0xf] %vm964_vm4, %v963_v63 }
0x1609   :  { %997 = dma.vmem_to_hbm [thread:$0]  %s993_s24, 64, %s995_s27, [#allocation11]  }
0x160a   :  { %1008 = dma.vmem_to_hbm [thread:$0]  %s1004_s29, 64, %s1006_s11, [#allocation11]  }
0x160e   :  { %v942_v12 = vpop.permute.xlu1 %941 }
0x160f   :  { %944 = vst.msk [vmem:[#allocation9 + $0x1c] sm:$0xf] %vm267_vm0, %v942_v12 }
0x1610   :  { %986 = dma.vmem_to_hbm [thread:$0]  %s979_s2, 512, %s981_s6, [#allocation5], %s1309_s9, %s1309_s9, %s1310_s10  }
0x1611   :  { %1304 = dma.done.wait [#allocation5], 512  }
0x1612   :  { %1305 = vsyncadd [#allocation5], 4294966784 }
0x1613   :  { %1306 = dma.done.wait [#allocation11], 128  }
0x1614   :  { %1307 = vsyncadd [#allocation11], 4294967168 }
0x1615   :  { %1021 = vsyncpa [#allocation4], 1 }
0x1616   :  { %1022 = vsyncpa [#allocation7], 1 }
0x1617   :  { %1023 = vsyncpa [#allocation5], 1 }
0x1618   :  { %1024 = vsyncpa [#allocation11], 1 }

</bundles_post_ra>
